<compile_context>
chip_gen: v6e
topology: v6e:2x2x1
jax: 0.10.0
libtpu: 0.0.40
codegen_flags: <defaults>
</compile_context>

<pallas_src>
import functools

import jax
import jax.numpy as jnp
from jax.experimental import pallas as pl
from jax.experimental.pallas import tpu as pltpu


def gat_pool_kernel(h_ref, src_ref, dst_ref, adj_ref, bias_ref,
                    pool_ref, pw_ref, pb_ref,
                    part_ref, scores_ref,
                    m_sc, l_sc, acc_sc, *, compute_dtype):
    f32 = jnp.float32
    bf16 = jnp.bfloat16
    s = pl.program_id(1)

    @pl.when(s == 0)
    def _():
        m_sc[...] = jnp.full_like(m_sc, -1e30)
        l_sc[...] = jnp.zeros_like(l_sc)
        acc_sc[...] = jnp.zeros_like(acc_sc)

    # e[i, j] = LeakyReLU(a_dst.h_i + a_src.h_j) for this (row, src) tile,
    # masked to edges j -> i.  The whole (TN, TS) elementwise chain runs in
    # `compute_dtype` (bf16 on v6e/v7x, f32 on v5e); max/denominator/output
    # accumulation stay f32.
    e = dst_ref[...].astype(compute_dtype) + src_ref[...].astype(compute_dtype)
    e = jnp.where(e > 0, e, 0.2 * e)                     # LeakyReLU(0.2)
    e = jnp.where(adj_ref[...] != 0, e, -1e30)           # int8 compare, no f32 mask

    # Online (flash-style) softmax over the source axis.
    m_prev = m_sc[...]
    m_new = jnp.maximum(m_prev, jnp.max(e, axis=-1, keepdims=True).astype(f32))
    a = jnp.exp(m_prev - m_new)                          # (TN, 1) f32 rescale
    p = jnp.exp(e - m_new.astype(compute_dtype))         # (TN, TS) unnormalized alpha
    l_sc[...] = a * l_sc[...] + jnp.sum(p.astype(f32), axis=-1, keepdims=True)
    acc_sc[...] = a * acc_sc[...] + jnp.dot(
        p.astype(bf16), h_ref[...], preferred_element_type=f32)
    m_sc[...] = m_new

    @pl.when(s == pl.num_programs(1) - 1)
    def _():
        # Normalization folded into the (TN, Dout) result (not the (TN, TS)
        # alpha tile); reciprocal on the EUP. Self-loops guarantee >=1 unmasked
        # lane; the guard keeps degenerate rows finite.
        inv = pl.reciprocal(jnp.maximum(l_sc[...], 1e-20), approx=True)
        out = acc_sc[...] * inv + bias_ref[...]          # (TN, Dout) f32

        # Score projection as a VPU/XLU reduction, sigmoid, attention weighting.
        logits = jnp.sum(out * pw_ref[...], axis=-1, keepdims=True) + pb_ref[...]
        scores = jax.nn.sigmoid(logits)                  # (TN, 1)
        weighted = scores * out                          # (TN, Dout)

        # Per-row-tile partial of global_mean_pool (1/|graph| folded in pool_ref).
        part_ref[...] = jnp.dot(pool_ref[...], weighted,
                                preferred_element_type=f32)   # (G, Dout)

        # Lane-dense scores (nodes on lanes); wrapper reshapes to (N, 1).
        scores_ref[...] = jnp.transpose(scores, (1, 0))  # (1, TN)


def _softmax_compute_dtype():
    """bf16 elementwise softmax on chips with bf16 VALU/EUP (v6e/v7x); f32 on
    v5e and older where bf16 elementwise only adds convert passes."""
    try:
        kind = jax.devices()[0].device_kind.lower()
    except Exception:
        return jnp.float32
    if any(tag in kind for tag in ("v2", "v3", "v4", "v5")):
        return jnp.float32
    return jnp.bfloat16


def _pick_tiles(n_pad, dout, vmem_budget_bytes=24 * 1024 * 1024):
    """Row tile fixed at 128 (lane-dense scores blocks). Source tile = largest
    128-multiple divisor of n_pad whose estimated per-step working set
    (double-buffered DMA inputs + (TN, TS) elementwise temporaries) fits the
    budget, kept <= ~24 MiB so it also fits v7x's 64 MiB VMEM."""
    tile_n = 128

    def largest_divisor(cap):
        t = max(128, min(n_pad, cap))
        while n_pad % t:
            t -= 128
        return t

    def working_set(tn, ts):
        adj_b = 2 * tn * ts                 # int8 adj, double-buffered
        h_b = 2 * ts * dout * 2             # bf16 h tile, double-buffered
        tmp_b = tn * ts * 10                # e / p + one cast pass (bf16/f32 mix)
        acc_b = tn * dout * 4 + 2 * tn * 4  # f32 scratch
        return adj_b + h_b + tmp_b + acc_b

    tile_s = largest_divisor(2048)
    while tile_s > 128 and working_set(tile_n, tile_s) > vmem_budget_bytes:
        tile_s = largest_divisor(tile_s - 128)
    return tile_n, tile_s


def gat_pool_layer(x, adj, pool_w, params):
    f32, bf16 = jnp.float32, jnp.bfloat16
    N, _ = x.shape
    Dout = params["w"].shape[1]
    G = pool_w.shape[0]

    # Hoisted, tile-invariant precompute (runs once in XLA, not once per tile).
    h = jnp.dot(x, params["w"], preferred_element_type=f32)            # (N, Dout)
    src_row = jnp.sum(h * params["att_src"], axis=-1)[None, :]         # (1, N)
    dst_col = jnp.sum(h * params["att_dst"], axis=-1, keepdims=True)   # (N, 1)
    h_bf16 = h.astype(bf16)

    # Pad N up to a multiple of 128 (no silent un-tiled fallback). Padded rows
    # get a self loop (well-defined softmax) and zero pool weight.
    N_pad = ((N + 127) // 128) * 128
    pad = N_pad - N
    adj_i8 = adj.astype(jnp.int8)           # O(N^2) operand: 4x less DMA/VMEM than f32
    if pad:
        h_bf16 = jnp.pad(h_bf16, ((0, pad), (0, 0)))
        src_row = jnp.pad(src_row, ((0, 0), (0, pad)))
        dst_col = jnp.pad(dst_col, ((0, pad), (0, 0)))
        adj_i8 = jnp.pad(adj_i8, ((0, pad), (0, pad)))
        pad_idx = jnp.arange(N, N_pad)
        adj_i8 = adj_i8.at[pad_idx, pad_idx].set(1)
        pool_w = jnp.pad(pool_w, ((0, 0), (0, pad)))

    tile_n, tile_s = _pick_tiles(N_pad, Dout)
    num_row_tiles = N_pad // tile_n
    num_src_tiles = N_pad // tile_s

    kernel = functools.partial(gat_pool_kernel,
                               compute_dtype=_softmax_compute_dtype())

    const = lambda shape: pl.BlockSpec(shape, lambda r, s: (0,) * len(shape))

    out_shapes = (
        jax.ShapeDtypeStruct((num_row_tiles, G, Dout), f32),   # pooled partials
        jax.ShapeDtypeStruct((1, N_pad), f32),                 # lane-dense scores
    )

    pool_parts, scores_row = pl.pallas_call(
        kernel,
        out_shape=out_shapes,
        grid=(num_row_tiles, num_src_tiles),
        in_specs=[
            pl.BlockSpec((tile_s, Dout), lambda r, s: (s, 0)),    # h (bf16), src tile
            pl.BlockSpec((1, tile_s), lambda r, s: (0, s)),       # a_src . h_j logits
            pl.BlockSpec((tile_n, 1), lambda r, s: (r, 0)),       # a_dst . h_i logits
            pl.BlockSpec((tile_n, tile_s), lambda r, s: (r, s)),  # adjacency (int8)
            const((1, Dout)),                                     # GATConv bias
            pl.BlockSpec((G, tile_n), lambda r, s: (0, r)),       # pool cols (mean folded)
            const((1, Dout)),                                     # proj weight row
            const((1, 1)),                                        # proj bias
        ],
        out_specs=(
            pl.BlockSpec((None, G, Dout), lambda r, s: (r, 0, 0)),
            pl.BlockSpec((1, tile_n), lambda r, s: (0, r)),
        ),
        scratch_shapes=[
            pltpu.VMEM((tile_n, 1), f32),      # running max
            pltpu.VMEM((tile_n, 1), f32),      # running denominator
            pltpu.VMEM((tile_n, Dout), f32),   # output accumulator
        ],
        compiler_params=pltpu.CompilerParams(
            dimension_semantics=("parallel", "arbitrary")),
    )(h_bf16, src_row, dst_col, adj_i8, params["bias"],
      pool_w, params["proj_w"], params["proj_b"])

    pooled = jnp.sum(pool_parts, axis=0)                 # tiny (R, G, Dout) -> (G, Dout)
    attention_scores = scores_row[:, :N].reshape(N, 1)
    return pooled, attention_scores


def build_dense_graph(edge_index, batch, num_nodes, num_graphs):
    """Dense int8 adjacency (self loops added, PyG default) + mean-pool matrix
    with 1/|graph| folded in so the kernel's per-tile partials just sum."""
    src, dst = edge_index
    adj = jnp.zeros((num_nodes, num_nodes), jnp.int8)
    adj = adj.at[dst, src].set(1)
    adj = jnp.maximum(adj, jnp.eye(num_nodes, dtype=jnp.int8))   # self loops
    onehot = (batch[None, :] == jnp.arange(num_graphs)[:, None]).astype(jnp.float32)
    counts = jnp.sum(onehot, axis=1, keepdims=True)
    pool_w = onehot / jnp.maximum(counts, 1.0)
    return adj, pool_w


def gat_pool_reference(x, adj, pool_w, params):
    """Pure-JAX f32 reference of the fused layer (validation only)."""
    adj = adj.astype(jnp.float32)
    h = x @ params["w"]
    src = jnp.sum(h * params["att_src"], axis=-1)
    dst = jnp.sum(h * params["att_dst"], axis=-1)
    e = dst[:, None] + src[None, :]
    e = jnp.where(e > 0, e, 0.2 * e)
    e = jnp.where(adj > 0, e, -jnp.inf)
    alpha = jax.nn.softmax(e, axis=-1)
    out = alpha @ h + params["bias"]
    logits = jnp.sum(out * params["proj_w"], axis=-1, keepdims=True) + params["proj_b"]
    scores = jax.nn.sigmoid(logits)
    pooled = pool_w @ (scores * out)
    return pooled, scores


if __name__ == "__main__":
    NODES_PER_GRAPH = 128
    G = 2
    N = G * NODES_PER_GRAPH        # 256 nodes total -> 2 row tiles of 128
    DIN = 8                        # input_dim
    DOUT = 32                      # output_dim

    key = jax.random.PRNGKey(0)
    kx, kw, ks, kd, kb, kpw, kpb = jax.random.split(key, 7)

    # Node features.
    x = jax.random.normal(kx, (N, DIN), jnp.float32)

    # Deterministic synthetic parameters (torch/PyG shapes).
    params = {
        "w":       jax.random.normal(kw, (DIN, DOUT), jnp.float32) * 0.1,  # GATConv.lin.weight^T
        "att_src": jax.random.normal(ks, (1, DOUT), jnp.float32) * 0.1,
        "att_dst": jax.random.normal(kd, (1, DOUT), jnp.float32) * 0.1,
        "bias":    jax.random.normal(kb, (1, DOUT), jnp.float32) * 0.1,
        "proj_w":  jax.random.normal(kpw, (1, DOUT), jnp.float32) * 0.1,   # nn.Linear(DOUT, 1).weight
        "proj_b":  jax.random.normal(kpb, (1, 1), jnp.float32) * 0.1,
    }

    # Two bidirectional ring graphs of 128 nodes each + batch assignment.
    srcs, dsts = [], []
    for g in range(G):
        base = g * NODES_PER_GRAPH
        for i in range(NODES_PER_GRAPH):
            a, b = base + i, base + (i + 1) % NODES_PER_GRAPH
            srcs += [a, b]
            dsts += [b, a]
    edge_index = (jnp.asarray(srcs, jnp.int32), jnp.asarray(dsts, jnp.int32))
    batch = jnp.repeat(jnp.arange(G, dtype=jnp.int32), NODES_PER_GRAPH)

    adj, pool_w = build_dense_graph(edge_index, batch, N, G)

    pooled, attention_scores = jax.block_until_ready(
        gat_pool_layer(x, adj, pool_w, params))

    ref_pooled, ref_scores = gat_pool_reference(x, adj, pool_w, params)

    assert pooled.shape == (G, DOUT) and attention_scores.shape == (N, 1)
    assert bool(jnp.all(jnp.isfinite(pooled)))
    assert bool(jnp.all(jnp.isfinite(attention_scores)))
    assert bool(jnp.allclose(pooled, ref_pooled, rtol=5e-2, atol=1e-2)), "pooled mismatch"
    assert bool(jnp.allclose(attention_scores, ref_scores, rtol=5e-2, atol=1e-2)), "scores mismatch"
    print("KERNEL_OK")
</pallas_src>

<mosaic_0001>
module attributes {stable_mosaic.version = 11 : i64} {
  func.func @gat_pool_kernel(%arg0: i32, %arg1: i32, %arg2: memref<256x32xbf16, #tpu.memory_space<vmem>>, %arg3: memref<1x256xf32, #tpu.memory_space<vmem>>, %arg4: memref<128x1xf32, #tpu.memory_space<vmem>>, %arg5: memref<128x256xi8, #tpu.memory_space<vmem>>, %arg6: memref<1x32xf32, #tpu.memory_space<vmem>>, %arg7: memref<2x128xf32, #tpu.memory_space<vmem>>, %arg8: memref<1x32xf32, #tpu.memory_space<vmem>>, %arg9: memref<1x1xf32, #tpu.memory_space<vmem>>, %arg10: memref<1x2x32xf32, #tpu.memory_space<vmem>>, %arg11: memref<1x128xf32, #tpu.memory_space<vmem>>, %arg12: memref<128x1xf32, #tpu.memory_space<vmem>>, %arg13: memref<128x1xf32, #tpu.memory_space<vmem>>, %arg14: memref<128x32xf32, #tpu.memory_space<vmem>>) attributes {dimension_semantics = [#tpu.dimension_semantics<parallel>, #tpu.dimension_semantics<arbitrary>], iteration_bounds = array<i64: 2, 1>, scalar_prefetch = 0 : i64, scratch_operands = 3 : i64, tpu.core_type = #tpu.core_type<tc>, window_params = [{transform_indices = @transform_0, window_bounds = array<i64: 256, 32>}, {transform_indices = @transform_1, window_bounds = array<i64: 1, 256>}, {transform_indices = @transform_2, window_bounds = array<i64: 128, 1>}, {transform_indices = @transform_3, window_bounds = array<i64: 128, 256>}, {pipeline_mode = #tpu.pipeline_mode<synchronous>, transform_indices = @transform_4, window_bounds = array<i64: 1, 32>}, {transform_indices = @transform_5, window_bounds = array<i64: 2, 128>}, {pipeline_mode = #tpu.pipeline_mode<synchronous>, transform_indices = @transform_6, window_bounds = array<i64: 1, 32>}, {pipeline_mode = #tpu.pipeline_mode<synchronous>, transform_indices = @transform_7, window_bounds = array<i64: 1, 1>}, {transform_indices = @transform_8, window_bounds = array<i64: 1, 2, 32>}, {transform_indices = @transform_9, window_bounds = array<i64: 1, 128>}]} {
    %c0_i32 = arith.constant 0 : i32
    %0 = arith.cmpi eq, %arg1, %c0_i32 : i32
    %1 = arith.extui %0 : i1 to i32
    %c0_i32_0 = arith.constant 0 : i32
    %2 = arith.cmpi ne, %1, %c0_i32_0 : i32
    scf.if %2 {
      %cst_27 = arith.constant -1.000000e+30 : f32
      %50 = vector.broadcast %cst_27 : f32 to vector<128x1xf32>
      %c0_28 = arith.constant 0 : index
      %c0_29 = arith.constant 0 : index
      %51 = vector.load %arg12[%c0_28, %c0_29] : memref<128x1xf32, #tpu.memory_space<vmem>>, vector<128x1xf32>
      tpu.vector_store %arg12[%c0_28, %c0_29], %50 {strides = array<i32>} : memref<128x1xf32, #tpu.memory_space<vmem>>, vector<128x1xf32>,
      %cst_30 = arith.constant 0.000000e+00 : f32
      %52 = vector.broadcast %cst_30 : f32 to vector<128x1xf32>
      %c0_31 = arith.constant 0 : index
      %c0_32 = arith.constant 0 : index
      %53 = vector.load %arg13[%c0_31, %c0_32] : memref<128x1xf32, #tpu.memory_space<vmem>>, vector<128x1xf32>
      tpu.vector_store %arg13[%c0_31, %c0_32], %52 {strides = array<i32>} : memref<128x1xf32, #tpu.memory_space<vmem>>, vector<128x1xf32>,
      %cst_33 = arith.constant 0.000000e+00 : f32
      %54 = vector.broadcast %cst_33 : f32 to vector<128x32xf32>
      %c0_34 = arith.constant 0 : index
      %c0_35 = arith.constant 0 : index
      %55 = vector.load %arg14[%c0_34, %c0_35] : memref<128x32xf32, #tpu.memory_space<vmem>>, vector<128x32xf32>
      tpu.vector_store %arg14[%c0_34, %c0_35], %54 {strides = array<i32>} : memref<128x32xf32, #tpu.memory_space<vmem>>, vector<128x32xf32>,
    } else {
    }
    %c0 = arith.constant 0 : index
    %c0_1 = arith.constant 0 : index
    %3 = vector.load %arg4[%c0, %c0_1] : memref<128x1xf32, #tpu.memory_space<vmem>>, vector<128x1xf32>
    %4 = arith.truncf %3 : vector<128x1xf32> to vector<128x1xbf16>
    %c0_2 = arith.constant 0 : index
    %c0_3 = arith.constant 0 : index
    %5 = vector.load %arg3[%c0_2, %c0_3] : memref<1x256xf32, #tpu.memory_space<vmem>>, vector<1x256xf32>
    %6 = arith.truncf %5 : vector<1x256xf32> to vector<1x256xbf16>
    %7 = vector.broadcast %4 : vector<128x1xbf16> to vector<128x256xbf16>
    %8 = vector.broadcast %6 : vector<1x256xbf16> to vector<128x256xbf16>
    %9 = arith.addf %7, %8 : vector<128x256xbf16>
    %cst = arith.constant 0.000000e+00 : bf16
    %10 = vector.broadcast %cst : bf16 to vector<128x256xbf16>
    %11 = arith.cmpf ogt, %9, %10 : vector<128x256xbf16>
    %cst_4 = arith.constant 2.001950e-01 : bf16
    %12 = vector.broadcast %cst_4 : bf16 to vector<128x256xbf16>
    %13 = arith.mulf %12, %9 : vector<128x256xbf16>
    %14 = arith.select %11, %9, %13 : vector<128x256xi1>, vector<128x256xbf16>
    %c0_5 = arith.constant 0 : index
    %c0_6 = arith.constant 0 : index
    %15 = vector.load %arg5[%c0_5, %c0_6] : memref<128x256xi8, #tpu.memory_space<vmem>>, vector<128x256xi8>
    %c0_i8 = arith.constant 0 : i8
    %16 = vector.broadcast %c0_i8 : i8 to vector<128x256xi8>
    %17 = arith.cmpi ne, %15, %16 : vector<128x256xi8>
    %cst_7 = arith.constant -1.000000e+30 : f32
    %18 = arith.truncf %cst_7 : f32 to bf16
    %19 = vector.broadcast %18 : bf16 to vector<128x256xbf16>
    %20 = arith.select %17, %14, %19 : vector<128x256xi1>, vector<128x256xbf16>
    %c0_8 = arith.constant 0 : index
    %c0_9 = arith.constant 0 : index
    %21 = vector.load %arg12[%c0_8, %c0_9] : memref<128x1xf32, #tpu.memory_space<vmem>>, vector<128x1xf32>
    %cst_10 = arith.constant dense<0xFF80> : vector<128xbf16>
    %22 = vector.multi_reduction <maximumf>, %20, %cst_10 [1] : vector<128x256xbf16> to vector<128xbf16>
    %23 = vector.shape_cast %22 : vector<128xbf16> to vector<128x1xbf16>
    %24 = arith.extf %23 : vector<128x1xbf16> to vector<128x1xf32>
    %25 = arith.maximumf %21, %24 : vector<128x1xf32>
    %26 = arith.subf %21, %25 : vector<128x1xf32>
    %27 = math.exp %26 : vector<128x1xf32>
    %28 = arith.truncf %25 : vector<128x1xf32> to vector<128x1xbf16>
    %29 = vector.broadcast %28 : vector<128x1xbf16> to vector<128x256xbf16>
    %30 = arith.subf %20, %29 : vector<128x256xbf16>
    %31 = math.exp %30 : vector<128x256xbf16>
    %c0_11 = arith.constant 0 : index
    %c0_12 = arith.constant 0 : index
    %32 = vector.load %arg13[%c0_11, %c0_12] : memref<128x1xf32, #tpu.memory_space<vmem>>, vector<128x1xf32>
    %33 = arith.mulf %27, %32 : vector<128x1xf32>
    %34 = arith.extf %31 : vector<128x256xbf16> to vector<128x256xf32>
    %cst_13 = arith.constant dense<0.000000e+00> : vector<128xf32>
    %35 = vector.multi_reduction <add>, %34, %cst_13 [1] : vector<128x256xf32> to vector<128xf32>
    %36 = vector.shape_cast %35 : vector<128xf32> to vector<128x1xf32>
    %37 = arith.addf %33, %36 : vector<128x1xf32>
    %c0_14 = arith.constant 0 : index
    %c0_15 = arith.constant 0 : index
    %38 = vector.load %arg13[%c0_14, %c0_15] : memref<128x1xf32, #tpu.memory_space<vmem>>, vector<128x1xf32>
    tpu.vector_store %arg13[%c0_14, %c0_15], %37 {strides = array<i32>} : memref<128x1xf32, #tpu.memory_space<vmem>>, vector<128x1xf32>,
    %c0_16 = arith.constant 0 : index
    %c0_17 = arith.constant 0 : index
    %39 = vector.load %arg14[%c0_16, %c0_17] : memref<128x32xf32, #tpu.memory_space<vmem>>, vector<128x32xf32>
    %40 = vector.broadcast %27 : vector<128x1xf32> to vector<128x32xf32>
    %41 = arith.mulf %40, %39 : vector<128x32xf32>
    %c0_18 = arith.constant 0 : index
    %c0_19 = arith.constant 0 : index
    %42 = vector.load %arg2[%c0_18, %c0_19] : memref<256x32xbf16, #tpu.memory_space<vmem>>, vector<256x32xbf16>
    %cst_20 = arith.constant dense<0.000000e+00> : vector<128x32xf32>
    %43 = tpu.matmul %31, %42, %cst_20 {dimension_numbers = #tpu.dot_dimension_numbers<[1], [0], [0], [1], [0, 0, 1, 1], [], []>} : vector<128x256xbf16>, vector<256x32xbf16>, vector<128x32xf32> -> vector<128x32xf32>
    %44 = arith.addf %41, %43 : vector<128x32xf32>
    %c0_21 = arith.constant 0 : index
    %c0_22 = arith.constant 0 : index
    %45 = vector.load %arg14[%c0_21, %c0_22] : memref<128x32xf32, #tpu.memory_space<vmem>>, vector<128x32xf32>
    tpu.vector_store %arg14[%c0_21, %c0_22], %44 {strides = array<i32>} : memref<128x32xf32, #tpu.memory_space<vmem>>, vector<128x32xf32>,
    %c0_23 = arith.constant 0 : index
    %c0_24 = arith.constant 0 : index
    %46 = vector.load %arg12[%c0_23, %c0_24] : memref<128x1xf32, #tpu.memory_space<vmem>>, vector<128x1xf32>
    tpu.vector_store %arg12[%c0_23, %c0_24], %25 {strides = array<i32>} : memref<128x1xf32, #tpu.memory_space<vmem>>, vector<128x1xf32>,
    %c0_i32_25 = arith.constant 0 : i32
    %47 = arith.cmpi eq, %arg1, %c0_i32_25 : i32
    %48 = arith.extui %47 : i1 to i32
    %c0_i32_26 = arith.constant 0 : i32
    %49 = arith.cmpi ne, %48, %c0_i32_26 : i32
    scf.if %49 {
      %c0_27 = arith.constant 0 : index
      %c0_28 = arith.constant 0 : index
      %50 = vector.load %arg13[%c0_27, %c0_28] : memref<128x1xf32, #tpu.memory_space<vmem>>, vector<128x1xf32>
      %cst_29 = arith.constant 9.99999968E-21 : f32
      %51 = vector.broadcast %cst_29 : f32 to vector<128x1xf32>
      %52 = arith.maximumf %50, %51 : vector<128x1xf32>
      %53 = tpu.reciprocal %52 {approx = true} : vector<128x1xf32> -> vector<128x1xf32>
      %c0_30 = arith.constant 0 : index
      %c0_31 = arith.constant 0 : index
      %54 = vector.load %arg14[%c0_30, %c0_31] : memref<128x32xf32, #tpu.memory_space<vmem>>, vector<128x32xf32>
      %55 = vector.broadcast %53 : vector<128x1xf32> to vector<128x32xf32>
      %56 = arith.mulf %54, %55 : vector<128x32xf32>
      %c0_32 = arith.constant 0 : index
      %c0_33 = arith.constant 0 : index
      %57 = vector.load %arg6[%c0_32, %c0_33] : memref<1x32xf32, #tpu.memory_space<vmem>>, vector<1x32xf32>
      %58 = vector.broadcast %57 : vector<1x32xf32> to vector<128x32xf32>
      %59 = arith.addf %56, %58 : vector<128x32xf32>
      %c0_34 = arith.constant 0 : index
      %c0_35 = arith.constant 0 : index
      %60 = vector.load %arg8[%c0_34, %c0_35] : memref<1x32xf32, #tpu.memory_space<vmem>>, vector<1x32xf32>
      %61 = vector.broadcast %60 : vector<1x32xf32> to vector<128x32xf32>
      %62 = arith.mulf %59, %61 : vector<128x32xf32>
      %cst_36 = arith.constant dense<0.000000e+00> : vector<128xf32>
      %63 = vector.multi_reduction <add>, %62, %cst_36 [1] : vector<128x32xf32> to vector<128xf32>
      %64 = vector.shape_cast %63 : vector<128xf32> to vector<128x1xf32>
      %c0_37 = arith.constant 0 : index
      %c0_38 = arith.constant 0 : index
      %65 = vector.load %arg9[%c0_37, %c0_38] : memref<1x1xf32, #tpu.memory_space<vmem>>, vector<1x1xf32>
      %66 = vector.broadcast %65 : vector<1x1xf32> to vector<128x1xf32>
      %67 = arith.addf %64, %66 : vector<128x1xf32>
      %68 = arith.negf %67 : vector<128x1xf32>
      %69 = math.exp %68 : vector<128x1xf32>
      %cst_39 = arith.constant 1.000000e+00 : f32
      %70 = vector.broadcast %cst_39 : f32 to vector<128x1xf32>
      %71 = arith.addf %70, %69 : vector<128x1xf32>
      %72 = arith.divf %70, %71 : vector<128x1xf32>
      %73 = vector.broadcast %72 : vector<128x1xf32> to vector<128x32xf32>
      %74 = arith.mulf %73, %59 : vector<128x32xf32>
      %c0_40 = arith.constant 0 : index
      %c0_41 = arith.constant 0 : index
      %75 = vector.load %arg7[%c0_40, %c0_41] : memref<2x128xf32, #tpu.memory_space<vmem>>, vector<2x128xf32>
      %cst_42 = arith.constant dense<0.000000e+00> : vector<2x32xf32>
      %76 = tpu.matmul %75, %74, %cst_42 {dimension_numbers = #tpu.dot_dimension_numbers<[1], [0], [0], [1], [0, 0, 1, 1], [], []>} : vector<2x128xf32>, vector<128x32xf32>, vector<2x32xf32> -> vector<2x32xf32>
      %c0_43 = arith.constant 0 : index
      %c0_44 = arith.constant 0 : index
      %c0_45 = arith.constant 0 : index
      %77 = vector.load %arg10[%c0_43, %c0_44, %c0_45] : memref<1x2x32xf32, #tpu.memory_space<vmem>>, vector<1x2x32xf32>
      %78 = vector.shape_cast %77 : vector<1x2x32xf32> to vector<2x32xf32>
      %79 = vector.shape_cast %76 : vector<2x32xf32> to vector<1x2x32xf32>
      tpu.vector_store %arg10[%c0_43, %c0_44, %c0_45], %79 {strides = array<i32>} : memref<1x2x32xf32, #tpu.memory_space<vmem>>, vector<1x2x32xf32>,
      %80 = tpu.transpose %72, [1, 0] : vector<128x1xf32> -> vector<1x128xf32>
      %c0_46 = arith.constant 0 : index
      %c0_47 = arith.constant 0 : index
      %81 = vector.load %arg11[%c0_46, %c0_47] : memref<1x128xf32, #tpu.memory_space<vmem>>, vector<1x128xf32>
      tpu.vector_store %arg11[%c0_46, %c0_47], %80 {strides = array<i32>} : memref<1x128xf32, #tpu.memory_space<vmem>>, vector<1x128xf32>,
    } else {
    }
    return
  }
  func.func @transform_0(%arg0: i32, %arg1: i32) -> (i32, i32) {
    %c0_i32 = arith.constant 0 : i32
    %c0_i32_0 = arith.constant 0 : i32
    return %arg1, %c0_i32 : i32, i32
  }
  func.func @transform_1(%arg0: i32, %arg1: i32) -> (i32, i32) {
    %c0_i32 = arith.constant 0 : i32
    %c0_i32_0 = arith.constant 0 : i32
    return %c0_i32, %arg1 : i32, i32
  }
  func.func @transform_2(%arg0: i32, %arg1: i32) -> (i32, i32) {
    %c0_i32 = arith.constant 0 : i32
    %c0_i32_0 = arith.constant 0 : i32
    return %arg0, %c0_i32 : i32, i32
  }
  func.func @transform_3(%arg0: i32, %arg1: i32) -> (i32, i32) {
    %c0_i32 = arith.constant 0 : i32
    return %arg0, %arg1 : i32, i32
  }
  func.func @transform_4(%arg0: i32, %arg1: i32) -> (i32, i32) {
    %c0_i32 = arith.constant 0 : i32
    %c0_i32_0 = arith.constant 0 : i32
    %c0_i32_1 = arith.constant 0 : i32
    return %c0_i32, %c0_i32_0 : i32, i32
  }
  func.func @transform_5(%arg0: i32, %arg1: i32) -> (i32, i32) {
    %c0_i32 = arith.constant 0 : i32
    %c0_i32_0 = arith.constant 0 : i32
    return %c0_i32, %arg0 : i32, i32
  }
  func.func @transform_6(%arg0: i32, %arg1: i32) -> (i32, i32) {
    %c0_i32 = arith.constant 0 : i32
    %c0_i32_0 = arith.constant 0 : i32
    %c0_i32_1 = arith.constant 0 : i32
    return %c0_i32, %c0_i32_0 : i32, i32
  }
  func.func @transform_7(%arg0: i32, %arg1: i32) -> (i32, i32) {
    %c0_i32 = arith.constant 0 : i32
    %c0_i32_0 = arith.constant 0 : i32
    %c0_i32_1 = arith.constant 0 : i32
    return %c0_i32, %c0_i32_0 : i32, i32
  }
  func.func @transform_8(%arg0: i32, %arg1: i32) -> (i32, i32, i32) {
    %c0_i32 = arith.constant 0 : i32
    %c0_i32_0 = arith.constant 0 : i32
    %c0_i32_1 = arith.constant 0 : i32
    return %arg0, %c0_i32, %c0_i32_0 : i32, i32, i32
  }
  func.func @transform_9(%arg0: i32, %arg1: i32) -> (i32, i32) {
    %c0_i32 = arith.constant 0 : i32
    %c0_i32_0 = arith.constant 0 : i32
    return %c0_i32, %arg0 : i32, i32
  }
}

</mosaic_0001>

<bundles_post_ra>
// kernel: tpu_custom_call.1
= control target key start
LH: loop header
LB: loop body
LE: loop exit
PB: predicated region body
PF: predicated region fallthrough
CT: control target
= control target key end

     0   :  { %s3943_s0 = inlined_call_operand.vmem [shape: bf16[256,32], index: 0, kind: input, shape index: {}]   ;;  %s3944_s1 = inlined_call_operand.vmem [shape: f32[1,256], index: 1, kind: input, shape index: {}]   ;;  %s3945_s2 = inlined_call_operand.vmem [shape: f32[256,1], index: 2, kind: input, shape index: {}]   ;;  %s3946_s3 = inlined_call_operand.vmem [shape: s8[256,256], index: 3, kind: input, shape index: {}]   ;;  %s3947_s4 = inlined_call_operand.vmem [shape: f32[1,32], index: 4, kind: input, shape index: {}]   ;;  %s3948_s5 = inlined_call_operand.vmem [shape: f32[2,256], index: 5, kind: input, shape index: {}]   ;;  %s3949_s6 = inlined_call_operand.vmem [shape: f32[1,32], index: 6, kind: input, shape index: {}]   ;;  %s3950_s7 = inlined_call_operand.<no memory space> [shape: f32[1,1], index: 7, kind: input, shape index: {}]   ;;  %s3951_s8 = inlined_call_operand.hbm [shape: f32[2,2,32], index: 8, kind: output, shape index: {0}]   ;;  %s3952_s9 = inlined_call_operand.hbm [shape: f32[1,256], index: 9, kind: output, shape index: {1}]  }
   0x1   :  { %3955 = sst [smem:[#allocation12_spill]] %s3943_s0  ;;  %v15_v0 = vstv %s3950_s7 }
   0x2   :  { %3956 = sst [smem:[#allocation13_spill]] %s3944_s1  ;;  %16 = vst [vmem:[#allocation5] sm:$0x1] %v15_v0 }
   0x3   :  { %17 = vsyncpa [#allocation7], 0 }
   0x4   :  { %19 = vsyncpa [#allocation7 + $0x1], 0 }
   0x5   :  { %20 = vsyncpa [#allocation9], 0 }
   0x6   :  { %22 = vsyncpa [#allocation9 + $0x1], 0  ;;  %s2933_s11 = smov 0   ;;  %s2935_s12 = smov 0  }
   0x7   :  { %s2937_s13 = smov 0   ;;  %s2939_s14 = smov 0  }
   0x8   :  { %s2941_s15 = smov 0   ;;  %s2943_s16 = smov 0  }
   0x9 LB: > { %s2337_s7 = sadd.s32 4294967295, %s2872_s16   ;;  %s2338_s17 = sadd.s32 4294967294, %s2872_s16   ;;  %s2872_s16 = sphi %s2943_s16, %s28_s16   ;;  %s2868_s15 = sphi %s2941_s15, %s3985_s15   ;;  %s2864_s14 = sphi %s2939_s14, %s3984_s14   ;;  %s2860_s13 = sphi %s2937_s13, %s3983_s13   ;;  %s2856_s12 = sphi %s2935_s12, %s3982_s12   ;;  %s2852_s11 = sphi %s2933_s11, %s3981_s11  }
   0xa   : > { %s40_s18 = sadd.s32 1, %s2868_s15  ;;  %s242_s19 = sadd.s32 1, %s2860_s13 }
   0xb   : > { %p42_p0 = scmp.ge.s32.totalorder %s40_s18, 2  ;;  %p252_p1 = scmp.ne.s32.totalorder %s2860_s13, %s2856_s12 }
   0xc   : > { %p253_p2 = scmp.eq.s32.totalorder %s2337_s7, 1  ;;  %p258_p3 = scmp.ne.s32.totalorder %s2856_s12, %s2852_s11 }
   0xd   : > { %s3987_s18 = smov (%p42_p0, %s40_s18), 0  ;;  %p259_p5 = scmp.eq.s32.totalorder %s2338_s17, 1 }
   0xe   : > { %p2973_p4 = por %p253_p2, %p252_p1  ;;  %s239_s21 = ssub.s32 %s2868_s15, %s3987_s18 }
   0xf   : > { %p2343_p6 = scmp.ge.s32.totalorder %s2872_s16, 1  ;;  %p240_p7 = scmp.eq.s32.totalorder %s239_s21, 0 }
  0x10   : > { %p2980_p8 = por %p259_p5, %p258_p3  ;;  %p360_p9 = scmp.lt.s32.totalorder %s2872_s16, 3 }
  0x11   : > { %s2986_s23 = scalar_select %p240_p7, %s2860_s13, %s242_s19  }
  0x12   : > { %p361_p10 = pnand %p2343_p6, %p360_p9 }
  0x13   : > { %s2989_s24 = sshll.u32 (!%p361_p10), %s2864_s14, 4  ;;  %s2347_s30 = sshll.u32 (!%p361_p10), %s2864_s14, 2 }
  0x14   : > { %364 = sbr.rel (%p361_p10) target bundleno = 1331 (0x533), region = 52  ;;  %p435_p11 = scmp.lt.s32.totalorder (!%p361_p10), %s2989_s24, 31 }
  0x15   : > { %p442_p12 = scmp.lt.s32.totalorder (!%p361_p10), %s2347_s30, 7  ;;  %s3959_s1 = sld [smem:[#allocation13_spill]] (!%p361_p10) }
  0x16   : > { %s3964_s0 = sld [smem:[#allocation12_spill]] (!%p361_p10)  ;;  %p452_p13 = scmp.lt.s32.totalorder (!%p361_p10), %s2864_s14, 1 }
  0x17   : > { %s2183_s28 = scalar_lea.hbm (!%p361_p10), %s3952_s9, %s2989_s24 }
  0x19   : > { %v2874_v1 = vmov 0   ;;  %s436_s25 = scalar_select %p435_p11, %s2989_s24, 31  ;;  %vm465_vm0 = vcmask 7168   ;;  %v2875_v26 = vmov -1e+30   ;;  %v541_v29 = vlaneseq }
  0x1a   : > { %2589 = vset.pattern.permute.xlu1 %v2874_v1  ;;  %2588 = vset.pattern.permute.xlu0 %v2874_v1  ;;  %474 = vst.msk [vmem:[#allocation2 + $0x40] sm:$0xff] %vm465_vm0, %v2875_v26  ;;  %475 = vst.msk [vmem:[#allocation2 + $0x48] sm:$0xff] %vm465_vm0, %v2875_v26  ;;  %s3989_s30 = smov (!%p442_p12, %s2347_s30), 7 }
  0x1b   : > { %s2346_s26 = sshll.u32 %s436_s25, 3  ;;  %466 = vst.msk [vmem:[#allocation2] sm:$0xff] %vm465_vm0, %v2875_v26  ;;  %467 = vst.msk [vmem:[#allocation2 + $0x8] sm:$0xff] %vm465_vm0, %v2875_v26  ;;  %s2391_s10 = sshll.u32 %s3989_s30, 4  ;;  %v542_v32 = vshrl.u32 %v541_v29, 7 }
  0x1c   : > { %s438_s29 = scalar_lea.vmem %s3945_s2, %s2346_s26  ;;  %468 = vst.msk [vmem:[#allocation2 + $0x10] sm:$0xff] %vm465_vm0, %v2875_v26  ;;  %469 = vst.msk [vmem:[#allocation2 + $0x18] sm:$0xff] %vm465_vm0, %v2875_v26  ;;  %s3018_s19 = scalar_lea.vmem %s3946_s3, %s2391_s10  ;;  %v539_v43 = vld [vmem:[%s3959_s1] sm:$0x3] }
  0x1d   : > { %v523_v2 = vld [vmem:[%s438_s29 + $0x40] sm:$0xff]  ;;  %v524_v3 = vld [vmem:[%s438_s29 + $0x48] sm:$0xff]  ;;  %v525_v7 = vld [vmem:[%s438_s29 + $0x50] sm:$0xff]  ;;  %470 = vst.msk [vmem:[#allocation2 + $0x20] sm:$0xff] %vm465_vm0, %v2875_v26  ;;  %v3028_v37 = vsub.s32 0, %v542_v32  ;;  %v547_v41 = vsub.s32 1, %v542_v32 }
  0x1e   : > { %v515_v4 = vld [vmem:[%s438_s29] sm:$0xff]  ;;  %v535_v5 = vpack.c.bf16 %v524_v3, %v523_v2  ;;  %v516_v6 = vld [vmem:[%s438_s29 + $0x8] sm:$0xff]  ;;  %v526_v8 = vld [vmem:[%s438_s29 + $0x58] sm:$0xff]  ;;  %471 = vst.msk [vmem:[#allocation2 + $0x28] sm:$0xff] %vm465_vm0, %v2875_v26  ;;  %s2878_s10 = smov [#allocation8]  }
  0x1f   : > { %v531_v9 = vpack.c.bf16 %v516_v6, %v515_v4  ;;  %v527_v10 = vld [vmem:[%s438_s29 + $0x60] sm:$0xff]  ;;  %v528_v11 = vld [vmem:[%s438_s29 + $0x68] sm:$0xff]  ;;  %v536_v12 = vpack.c.bf16 %v526_v8, %v525_v7  ;;  %v517_v14 = vld [vmem:[%s438_s29 + $0x10] sm:$0xff]  ;;  %472 = vst.msk [vmem:[#allocation2 + $0x30] sm:$0xff] %vm465_vm0, %v2875_v26  ;;  %v544_v47 = vrot.slane %v539_v43, %v3028_v37  ;;  %v548_v48 = vrot.slane %v539_v43, %v547_v41  ;;  %s2770_s7 = sshll.u32 %s2878_s10, 4  ;;  %s2771_s7 = int_to_ptr.vmem [resolvable:$false] %s2770_s7 }
  0x20   : > { %575 = vperm.xlu0 %2588, %v535_v5   ;;  %v537_v13 = vpack.c.bf16 %v528_v11, %v527_v10  ;;  %v518_v15 = vld [vmem:[%s438_s29 + $0x18] sm:$0xff]  ;;  %v529_v16 = vld [vmem:[%s438_s29 + $0x70] sm:$0xff]  ;;  %v519_v19 = vld [vmem:[%s438_s29 + $0x20] sm:$0xff]  ;;  %473 = vst.msk [vmem:[#allocation2 + $0x38] sm:$0xff] %vm465_vm0, %v2875_v26 }
  0x21   : > { %555 = vperm.xlu1 %2589, %v531_v9   ;;  %v530_v17 = vld [vmem:[%s438_s29 + $0x78] sm:$0xff]  ;;  %v532_v18 = vpack.c.bf16 %v518_v15, %v517_v14  ;;  %v520_v20 = vld [vmem:[%s438_s29 + $0x28] sm:$0xff]  ;;  %v521_v22 = vld [vmem:[%s438_s29 + $0x30] sm:$0xff]  ;;  %476 = vst.msk [vmem:[#allocation2 + $0x50] sm:$0xff] %vm465_vm0, %v2875_v26  ;;  %v551_v52 = vpack.c.bf16 %v544_v47, %v544_v47  ;;  %v552_v53 = vpack.c.bf16 %v548_v48, %v548_v48 }
  0x22   : > { %v538_v21 = vpack.c.bf16 %v530_v17, %v529_v16  ;;  %v522_v23 = vld [vmem:[%s438_s29 + $0x38] sm:$0xff]  ;;  %v533_v24 = vpack.c.bf16 %v520_v20, %v519_v19  ;;  %477 = vst.msk [vmem:[#allocation2 + $0x58] sm:$0xff] %vm465_vm0, %v2875_v26  ;;  %478 = vst.msk [vmem:[#allocation2 + $0x60] sm:$0xff] %vm465_vm0, %v2875_v26  ;;  %v675_v27 = vld [vmem:[%s3018_s19 + $0x20] sm:$0xff]  ;;  %s453_s29 = scalar_select %p452_p13, %s2864_s14, 1 }
  0x23   : > { %v534_v25 = vpack.c.bf16 %v522_v23, %v521_v22  ;;  %479 = vst.msk [vmem:[#allocation2 + $0x68] sm:$0xff] %vm465_vm0, %v2875_v26  ;;  %480 = vst.msk [vmem:[#allocation2 + $0x70] sm:$0xff] %vm465_vm0, %v2875_v26  ;;  %v676_v28 = vld [vmem:[%s3018_s19 + $0x28] sm:$0xff]  ;;  %vm683_vm1 = vnez %v675_v27  ;;  %v671_v30 = vld [vmem:[%s3018_s19] sm:$0xff]  ;;  %v594_v6 = vpack.i.b16 %v551_v52, %v551_v52  ;;  %v601_v7 = vpack.i.b16 %v552_v53, %v552_v53 }
  0x24   : > { %580 = vperm.xlu0 %2588, %v536_v12   ;;  %481 = vst.msk [vmem:[#allocation2 + $0x78] sm:$0xff] %vm465_vm0, %v2875_v26  ;;  %vm684_vm2 = vnez %v676_v28  ;;  %v672_v31 = vld [vmem:[%s3018_s19 + $0x8] sm:$0xff]  ;;  %v705_v33 = vsel %vm683_vm1, 16843009, %v2874_v1  ;;  %vm679_vm3 = vnez %v671_v30  ;;  %v677_v35 = vld [vmem:[%s3018_s19 + $0x30] sm:$0xff]  ;;  %v678_v36 = vld [vmem:[%s3018_s19 + $0x38] sm:$0xff] }
  0x25   : > { %585 = vperm.xlu1 %2589, %v537_v13   ;;  %v706_v34 = vsel %vm684_vm2, 16843009, %v2874_v1  ;;  %vm680_vm4 = vnez %v672_v31  ;;  %v701_v39 = vsel %vm679_vm3, 16843009, %v2874_v1  ;;  %vm685_vm5 = vnez %v677_v35  ;;  %v673_v0 = vld [vmem:[%s3018_s19 + $0x10] sm:$0xff]  ;;  %v674_v2 = vld [vmem:[%s3018_s19 + $0x18] sm:$0xff] }
  0x26   : > { %v713_v38 = vcombine.low %v705_v33, %v706_v34  ;;  %v702_v40 = vsel %vm680_vm4, 16843009, %v2874_v1  ;;  %v714_v42 = vcombine.high %v705_v33, %v706_v34  ;;  %vm686_vm6 = vnez %v678_v36  ;;  %s2350_s30 = sshll.u32 %s453_s29, 1  ;;  %s3871_s19 = sand.u32 1, %s2856_s12  }
  0x27   : > { %v709_v44 = vcombine.low %v701_v39, %v702_v40  ;;  %v707_v45 = vsel %vm685_vm5, 16843009, %v2874_v1  ;;  %v708_v46 = vsel %vm686_vm6, 16843009, %v2874_v1  ;;  %v710_v54 = vcombine.high %v701_v39, %v702_v40  ;;  %s455_s17 = scalar_lea.vmem %s3948_s5, %s2350_s30  ;;  %s422_s21 = scalar_lea.vmem [#allocation8], %s3871_s19 }
  0x28   : > { %560 = vperm.xlu0 %2588, %v532_v18   ;;  %vm721_vm7 = vnez %v713_v38  ;;  %vm722_vm8 = vnez %v714_v42  ;;  %v715_v50 = vcombine.low %v707_v45, %v708_v46  ;;  %v716_v5 = vcombine.high %v707_v45, %v708_v46  ;;  %s2185_s25 = sshll.u32 %s422_s21, 4  ;;  %s2160_s29 = scalar_lea.sflag [#allocation9], %s3871_s19  ;;  %s2186_s25 = int_to_ptr.vmem [resolvable:$true] %s2185_s25 }
  0x29   : > { %590 = vperm.xlu1 %2589, %v538_v21   ;;  %v729_v49 = vsel %vm721_vm7, 16843009, %v2874_v1  ;;  %vm717_vm9 = vnez %v709_v44  ;;  %v730_v51 = vsel %vm722_vm8, 16843009, %v2874_v1  ;;  %vm718_vm11 = vnez %v710_v54  ;;  %s2766_s30 = scalar_lea.vmem %s2186_s25, 16  ;;  %p2773_p3 = scmp.lt.s32.totalorder %s2186_s25, %s2771_s7 }
  0x2a   : > { %v757_v55 = vunpack.c.1.s8 %v729_v49  ;;  %v758_v56 = vunpack.c.0.s8 %v729_v49  ;;  %v760_v57 = vunpack.c.3.s8 %v729_v49  ;;  %v725_v58 = vsel %vm717_vm9, 16843009, %v2874_v1  ;;  %p2767_p0 = scmp.ne.s32.totalorder %s2186_s25, %s2766_s30 }
  0x2b   : > { %v761_v59 = vunpack.c.2.s8 %v729_v49  ;;  %v763_v60 = vunpack.c.1.s8 %v730_v51  ;;  %v764_v61 = vunpack.c.0.s8 %v730_v51  ;;  %vm723_vm10 = vnez %v715_v50 }
  0x2c   : > { %565 = vperm.xlu0 %2588, %v533_v24   ;;  %v766_v62 = vunpack.c.3.s8 %v730_v51  ;;  %v767_v63 = vunpack.c.2.s8 %v730_v51  ;;  %v733_v3 = vunpack.c.1.s8 %v725_v58  ;;  %v734_v4 = vunpack.c.0.s8 %v725_v58  ;;  %p2768_p1 = pnand %p2767_p0, %p2973_p4 }
  0x2d   : > { %570 = vperm.xlu1 %2589, %v534_v25   ;;  %v3043_v8 = vpack.c.b16 %v757_v55, %v758_v56  ;;  %v731_v9 = vsel %vm723_vm10, 16843009, %v2874_v1  ;;  %v3046_v10 = vpack.c.b16 %v760_v57, %v761_v59  ;;  %v3048_v11 = vpack.c.b16 %v763_v60, %v764_v61 }
  0x2e   : > { %vm681_vm12 = vnez %v673_v0  ;;  %vm682_vm13 = vnez %v674_v2  ;;  %v3050_v12 = vpack.c.b16 %v766_v62, %v767_v63  ;;  %v736_v13 = vunpack.c.3.s8 %v725_v58  ;;  %p2769_p2 = pneg %p2768_p1 }
  0x2f   : > { %v737_v14 = vunpack.c.2.s8 %v725_v58  ;;  %v726_v15 = vsel %vm718_vm11, 16843009, %v2874_v1  ;;  %v3053_v16 = vpack.c.b16 %v733_v3, %v734_v4  ;;  %v769_v17 = vunpack.c.1.s8 %v731_v9 }
  0x30   : > { %v770_v18 = vunpack.c.0.s8 %v731_v9  ;;  %vm724_vm14 = vnez %v716_v5  ;;  %v772_v19 = vunpack.c.3.s8 %v731_v9  ;;  %v773_v20 = vunpack.c.2.s8 %v731_v9 }
  0x31   : > { %v703_v21 = vsel %vm681_vm12, 16843009, %v2874_v1  ;;  %v704_v22 = vsel %vm682_vm13, 16843009, %v2874_v1  ;;  %v739_v23 = vunpack.c.1.s8 %v726_v15  ;;  %v740_v24 = vunpack.c.0.s8 %v726_v15 }
  0x32   : > { %v742_v25 = vunpack.c.3.s8 %v726_v15  ;;  %v743_v26 = vunpack.c.2.s8 %v726_v15  ;;  %v3058_v27 = vrot.slane %v594_v6, %v3028_v37  ;;  %v3061_v28 = vrot.slane %v601_v7, %v3028_v37 }
  0x33   : > { %v3063_v29 = vpack.c.b16 %v736_v13, %v737_v14  ;;  %v732_v30 = vsel %vm724_vm14, 16843009, %v2874_v1  ;;  %vm789_vm15 = vcmp.ne.s16.totalorder %v3043_v8, 0  ;;  %v711_v31 = vcombine.low %v703_v21, %v704_v22 }
  0x34   : > { %v712_v32 = vcombine.high %v703_v21, %v704_v22  ;;  %vm790_vm1 = vcmp.ne.s16.totalorder %v3046_v10, 0  ;;  %vm791_vm2 = vcmp.ne.s16.totalorder %v3048_v11, 0  ;;  %v3069_v33 = vpack.c.b16 %v769_v17, %v770_v18 }
  0x35   : > { %v3071_v34 = vpack.c.b16 %v772_v19, %v773_v20  ;;  %vm792_vm3 = vcmp.ne.s16.totalorder %v3050_v12, 0  ;;  %vm781_vm4 = vcmp.ne.s16.totalorder %v3053_v16, 0  ;;  %v3075_v36 = vpack.c.b16 %v739_v23, %v740_v24 }
  0x36   : > { %v3077_v37 = vpack.c.b16 %v742_v25, %v743_v26  ;;  %v775_v38 = vunpack.c.1.s8 %v732_v30  ;;  %v776_v39 = vunpack.c.0.s8 %v732_v30  ;;  %vm782_vm5 = vcmp.ne.s16.totalorder %v3063_v29, 0 }
  0x37   : > { %v778_v43 = vunpack.c.3.s8 %v732_v30  ;;  %v779_v44 = vunpack.c.2.s8 %v732_v30  ;;  %vm3084_vm6 = vnez %v711_v31  ;;  %vm3088_vm7 = vnez %v712_v32 }
  0x38   : > { %vm793_vm12 = vcmp.ne.s16.totalorder %v3069_v33, 0  ;;  %vm794_vm13 = vcmp.ne.s16.totalorder %v3071_v34, 0  ;;  %v3109_v5 = vpack.c.b16 %v775_v38, %v776_v39  ;;  %v727_v10 = vsel %vm3084_vm6, 16843009, %v2874_v1 }
  0x39   : > { %v3111_v6 = vpack.c.b16 %v778_v43, %v779_v44  ;;  %v3129_v18 = vsel %vm3088_vm7, 16843009, %v2874_v1  ;;  %v745_v16 = vunpack.c.1.s8 %v727_v10  ;;  %v746_v32 = vunpack.c.0.s8 %v727_v10 }
  0x3a   : > { %v755_v33 = vunpack.c.2.s8 %v3129_v18 }
  0x3b   : > { %vm796_vm7 = vcmp.ne.s16.totalorder %v3111_v6, 0 }
  0x9b   : > { %v576_v35 = vpop.permute.xlu0 %575 }
  0x9c   : > { %v615_v40 = vadd.bf16 %v3058_v27, %v576_v35  ;;  %v616_v41 = vadd.bf16 %v3061_v28, %v576_v35  ;;  %v556_v42 = vpop.permute.xlu1 %555  ;;  %v748_v35 = vunpack.c.3.s8 %v727_v10 }
  0x9d   : > { %v607_v45 = vadd.bf16 %v3058_v27, %v556_v42  ;;  %v608_v46 = vadd.bf16 %v3061_v28, %v556_v42 }
  0x9e   : > { %vm631_vm8 = vcmp.gt.bf16.partialorder %v615_v40, 0  ;;  %vm632_vm9 = vcmp.gt.bf16.partialorder %v616_v41, 0  ;;  %v647_v49 = vmul.bf16 1045249613, %v615_v40  ;;  %v648_v50 = vmul.bf16 1045249613, %v616_v41 }
  0x9f   : > { %v581_v51 = vpop.permute.xlu0 %580  ;;  %vm623_vm10 = vcmp.gt.bf16.partialorder %v607_v45, 0  ;;  %vm624_vm11 = vcmp.gt.bf16.partialorder %v608_v46, 0  ;;  %v639_v52 = vmul.bf16 1045249613, %v607_v45  ;;  %v640_v53 = vmul.bf16 1045249613, %v608_v46 }
  0xa0   : > { %v617_v54 = vadd.bf16 %v3058_v27, %v581_v51  ;;  %v618_v55 = vadd.bf16 %v3061_v28, %v581_v51  ;;  %v586_v56 = vpop.permute.xlu1 %585  ;;  %v663_v57 = vsel %vm631_vm8, %v615_v40, %v647_v49  ;;  %v664_v58 = vsel %vm632_vm9, %v616_v41, %v648_v50 }
  0xa1   : > { %v619_v59 = vadd.bf16 %v3058_v27, %v586_v56  ;;  %v620_v60 = vadd.bf16 %v3061_v28, %v586_v56  ;;  %v3098_v61 = vsel %vm789_vm15, %v663_v57, -1.00492276e+30  ;;  %v3102_v62 = vsel %vm790_vm1, %v664_v58, -1.00492276e+30 }
  0xa2   : > { %v841_v63 = vmax.bf16 %v3102_v62, %v3098_v61  ;;  %vm633_vm14 = vcmp.gt.bf16.partialorder %v617_v54, 0  ;;  %vm634_vm8 = vcmp.gt.bf16.partialorder %v618_v55, 0  ;;  %v649_v0 = vmul.bf16 1045249613, %v617_v54 }
  0xa3   : > { %v561_v2 = vpop.permute.xlu0 %560  ;;  %v650_v3 = vmul.bf16 1045249613, %v618_v55  ;;  %v655_v4 = vsel %vm623_vm10, %v607_v45, %v639_v52  ;;  %v656_v9 = vsel %vm624_vm11, %v608_v46, %v640_v53  ;;  %vm783_vm15 = vcmp.ne.s16.totalorder %v3075_v36, 0 }
  0xa4   : > { %v609_v7 = vadd.bf16 %v3058_v27, %v561_v2  ;;  %842 = vmax.xlane.bf16.xlu0 %v841_v63  ;;  %v665_v8 = vsel %vm633_vm14, %v617_v54, %v649_v0  ;;  %vm784_vm1 = vcmp.ne.s16.totalorder %v3077_v37, 0  ;;  %v610_v13 = vadd.bf16 %v3061_v28, %v561_v2  ;;  %v591_v14 = vpop.permute.xlu1 %590 }
  0xa5   : > { %v666_v15 = vsel %vm634_vm8, %v618_v55, %v650_v3  ;;  %v3124_v17 = vsel %vm791_vm2, %v665_v8, -1.00492276e+30  ;;  %v3137_v20 = vsel %vm781_vm4, %v655_v4, -1.00492276e+30  ;;  %vm635_vm6 = vcmp.gt.bf16.partialorder %v619_v59, 0 }
  0xa6   : > { %v3133_v19 = vsel %vm792_vm3, %v666_v15, -1.00492276e+30  ;;  %vm636_vm9 = vcmp.gt.bf16.partialorder %v620_v60, 0  ;;  %v3143_v21 = vsel %vm782_vm5, %v656_v9, -1.00492276e+30  ;;  %v621_v23 = vadd.bf16 %v3058_v27, %v591_v14 }
  0xa7   : > { %v844_v11 = vmax.bf16 %v3133_v19, %v3124_v17  ;;  %v651_v22 = vmul.bf16 1045249613, %v619_v59  ;;  %v652_v1 = vmul.bf16 1045249613, %v620_v60  ;;  %v622_v12 = vadd.bf16 %v3061_v28, %v591_v14  ;;  %v566_v24 = vpop.permute.xlu0 %565 }
  0xa8   : > { %v641_v25 = vmul.bf16 1045249613, %v609_v7  ;;  %vm625_vm2 = vcmp.gt.bf16.partialorder %v609_v7, 0  ;;  %vm626_vm3 = vcmp.gt.bf16.partialorder %v610_v13, 0  ;;  %vm795_vm4 = vcmp.ne.s16.totalorder %v3109_v5, 0  ;;  %v571_v46 = vpop.permute.xlu1 %570 }
  0xa9   : > { %845 = vmax.xlane.bf16.xlu1 %v844_v11  ;;  %v667_v26 = vsel %vm635_vm6, %v619_v59, %v651_v22  ;;  %v668_v30 = vsel %vm636_vm9, %v620_v60, %v652_v1  ;;  %v829_v29 = vmax.bf16 %v3143_v21, %v3137_v20  ;;  %v642_v31 = vmul.bf16 1045249613, %v610_v13  ;;  %v2590_v11 = vld [vmem:[%s3964_s0 + $0x78] sm:$0xff]   ;;  %v2592_v1 = vld [vmem:[%s3964_s0 + $0x70] sm:$0xff]  }
  0xaa   : > { %v611_v38 = vadd.bf16 %v3058_v27, %v566_v24  ;;  %v612_v39 = vadd.bf16 %v3061_v28, %v566_v24  ;;  %v749_v40 = vunpack.c.2.s8 %v727_v10  ;;  %v751_v41 = vunpack.c.1.s8 %v3129_v18  ;;  %v2591_v22 = vld [vmem:[%s3964_s0 + $0x38] sm:$0xff]   ;;  %2508 = vmatprep.subr.bf16.mxu1 %v2590_v11  ;;  %2392 = vmatprep.subr.bf16.mxu0 %v2590_v11  ;;  %v2595_v24 = vld [vmem:[%s3964_s0 + $0x28] sm:$0xff]  }
  0xab   : > { %v3156_v42 = vsel %vm793_vm12, %v667_v26, -1.00492276e+30  ;;  %v3160_v43 = vsel %vm794_vm13, %v668_v30, -1.00492276e+30  ;;  %v657_v44 = vsel %vm625_vm2, %v609_v7, %v641_v25  ;;  %v658_v45 = vsel %vm626_vm3, %v610_v13, %v642_v31  ;;  %2516 = vmatpush3.bf16.msra.mxu1 %v2591_v22  ;;  %2393 = vmatpush3.bf16.msra.mxu0 %v2591_v22  ;;  %v3251_v25 = vld [vmem:[#allocation2 + $0x40] sm:$0xff]  ;;  %v3335_v22 = vld [vmem:[#allocation2 + $0x18] sm:$0xff] }
  0xac   : > { %830 = vmax.xlane.bf16.xlu0 %v829_v29  ;;  %v653_v47 = vmul.bf16 1045249613, %v621_v23  ;;  %v654_v48 = vmul.bf16 1045249613, %v622_v12  ;;  %v752_v49 = vunpack.c.0.s8 %v3129_v18  ;;  %v754_v50 = vunpack.c.3.s8 %v3129_v18  ;;  %2509 = vmatprep.subr.bf16.mxu1 %v2592_v1 }
  0xad   : > { %vm637_vm5 = vcmp.gt.bf16.partialorder %v621_v23, 0  ;;  %vm638_vm10 = vcmp.gt.bf16.partialorder %v622_v12, 0  ;;  %v747_v51 = vpack.c.b16 %v745_v16, %v746_v32  ;;  %v847_v52 = vmax.bf16 %v3160_v43, %v3156_v42  ;;  %2394 = vmatprep.subr.bf16.mxu0 %v2592_v1  ;;  %v3253_v16 = vld [vmem:[#allocation2 + $0x48] sm:$0xff] }
  0xae   : > { %v3169_v34 = vsel %vm783_vm15, %v657_v44, -1.00492276e+30  ;;  %v3173_v53 = vsel %vm784_vm1, %v658_v45, -1.00492276e+30  ;;  %v750_v54 = vpack.c.b16 %v748_v35, %v749_v40  ;;  %v613_v55 = vadd.bf16 %v3058_v27, %v571_v46  ;;  %v3271_v40 = vld [vmem:[#allocation2 + $0x58] sm:$0xff] }
  0xaf   : > { %v614_v56 = vadd.bf16 %v3061_v28, %v571_v46  ;;  %v643_v57 = vmul.bf16 1045249613, %v611_v38  ;;  %v644_v58 = vmul.bf16 1045249613, %v612_v39  ;;  %v669_v59 = vsel %vm637_vm5, %v621_v23, %v653_v47  ;;  %v2593_v23 = vld [vmem:[%s3964_s0 + $0x30] sm:$0xff]   ;;  %v3275_v47 = vld [vmem:[#allocation2] sm:$0xff] }
  0xb0   : > { %v670_v60 = vsel %vm638_vm10, %v622_v12, %v654_v48  ;;  %vm627_vm11 = vcmp.gt.bf16.partialorder %v611_v38, 0  ;;  %vm628_vm12 = vcmp.gt.bf16.partialorder %v612_v39, 0  ;;  %v832_v36 = vmax.bf16 %v3173_v53, %v3169_v34  ;;  %v2594_v12 = vld [vmem:[%s3964_s0 + $0x68] sm:$0xff]   ;;  %2517 = vmatpush3.bf16.msra.mxu1 %v2593_v23  ;;  %2395 = vmatpush3.bf16.msra.mxu0 %v2593_v23  ;;  %v2600_v23 = vld [vmem:[%s3964_s0 + $0x50] sm:$0xff]  }
  0xb1   : > { %848 = vmax.xlane.bf16.xlu1 %v847_v52  ;;  %vm785_vm13 = vcmp.ne.s16.totalorder %v747_v51, 0  ;;  %vm786_vm14 = vcmp.ne.s16.totalorder %v750_v54, 0  ;;  %v3181_v37 = vsel %vm795_vm4, %v669_v59, -1.00492276e+30  ;;  %v3185_v27 = vsel %vm796_vm7, %v670_v60, -1.00492276e+30  ;;  %2510 = vmatprep.subr.bf16.mxu1 %v2594_v12 }
  0xb2   : > { %v659_v28 = vsel %vm627_vm11, %v611_v38, %v643_v57  ;;  %v660_v63 = vsel %vm628_vm12, %v612_v39, %v644_v58  ;;  %v645_v0 = vmul.bf16 1045249613, %v613_v55  ;;  %v646_v2 = vmul.bf16 1045249613, %v614_v56  ;;  %2396 = vmatprep.subr.bf16.mxu0 %v2594_v12  ;;  %v3269_v39 = vld [vmem:[#allocation2 + $0x50] sm:$0xff]  ;;  %v2597_v52 = vld [vmem:[%s3964_s0 + $0x20] sm:$0xff]  }
  0xb3   : > { %v753_v3 = vpack.c.b16 %v751_v41, %v752_v49  ;;  %v756_v4 = vpack.c.b16 %v754_v50, %v755_v33  ;;  %vm629_vm8 = vcmp.gt.bf16.partialorder %v613_v55, 0  ;;  %vm630_vm15 = vcmp.gt.bf16.partialorder %v614_v56, 0  ;;  %v3283_v50 = vld [vmem:[#allocation2 + $0x8] sm:$0xff]  ;;  %v2596_v33 = vld [vmem:[%s3964_s0 + $0x60] sm:$0xff]   ;;  %v2601_v12 = vld [vmem:[%s3964_s0 + $0x10] sm:$0xff]  }
  0xb4   : > { %833 = vmax.xlane.bf16.xlu0 %v832_v36  ;;  %v850_v7 = vmax.bf16 %v3185_v27, %v3181_v37  ;;  %v3189_v8 = vsel %vm785_vm13, %v659_v28, -1.00492276e+30  ;;  %v3191_v5 = vsel %vm786_vm14, %v660_v63, -1.00492276e+30  ;;  %v661_v9 = vsel %vm629_vm8, %v613_v55, %v645_v0  ;;  %2518 = vmatpush3.bf16.msra.mxu1 %v2595_v24  ;;  %v2598_v36 = vld [vmem:[%s3964_s0 + $0x58] sm:$0xff]   ;;  %v3318_v0 = vld [vmem:[#allocation2 + $0x60] sm:$0xff] }
  0xb5   : > { %v662_v6 = vsel %vm630_vm15, %v614_v56, %v646_v2  ;;  %vm787_vm1 = vcmp.ne.s16.totalorder %v753_v3, 0  ;;  %vm788_vm6 = vcmp.ne.s16.totalorder %v756_v4, 0  ;;  %v835_v10 = vmax.bf16 %v3191_v5, %v3189_v8  ;;  %2397 = vmatpush3.bf16.msra.mxu0 %v2595_v24  ;;  %2511 = vmatprep.subr.bf16.mxu1 %v2596_v33  ;;  %v3320_v2 = vld [vmem:[#allocation2 + $0x68] sm:$0xff] }
  0xb6   : > { %v3195_v13 = vsel %vm787_vm1, %v661_v9, -1.00492276e+30  ;;  %v3197_v14 = vsel %vm788_vm6, %v662_v6, -1.00492276e+30  ;;  %v3953_v18 = vmov 0.0   ;;  %2398 = vmatprep.subr.bf16.mxu0 %v2596_v33  ;;  %vm498_vm9 = vcmask 261120  }
  0xb7   : > { %v838_v15 = vmax.bf16 %v3197_v14, %v3195_v13  ;;  %497 = vst.msk [vmem:[#allocation3 + $0x78] sm:$0xff] %vm465_vm0, %v3953_v18  ;;  %482 = vst.msk [vmem:[#allocation3] sm:$0xff] %vm465_vm0, %v3953_v18 }
  0xb8   : > { %483 = vst.msk [vmem:[#allocation3 + $0x8] sm:$0xff] %vm465_vm0, %v3953_v18  ;;  %484 = vst.msk [vmem:[#allocation3 + $0x10] sm:$0xff] %vm465_vm0, %v3953_v18  ;;  %2519 = vmatpush3.bf16.msra.mxu1 %v2597_v52 }
  0xb9   : > { %851 = vmax.xlane.bf16.xlu1 %v850_v7  ;;  %485 = vst.msk [vmem:[#allocation3 + $0x18] sm:$0xff] %vm465_vm0, %v3953_v18  ;;  %486 = vst.msk [vmem:[#allocation3 + $0x20] sm:$0xff] %vm465_vm0, %v3953_v18  ;;  %2399 = vmatpush3.bf16.msra.mxu0 %v2597_v52  ;;  %v2599_v7 = vld [vmem:[%s3964_s0 + $0x18] sm:$0xff]   ;;  %v3370_v52 = vld [vmem:[#allocation2 + $0x70] sm:$0xff] }
  0xba   : > { %487 = vst.msk [vmem:[#allocation3 + $0x28] sm:$0xff] %vm465_vm0, %v3953_v18  ;;  %488 = vst.msk [vmem:[#allocation3 + $0x30] sm:$0xff] %vm465_vm0, %v3953_v18  ;;  %2512 = vmatprep.subr.bf16.mxu1 %v2598_v36  ;;  %2400 = vmatprep.subr.bf16.mxu0 %v2598_v36  ;;  %v2603_v36 = vld [vmem:[%s3964_s0 + $0x8] sm:$0xff]  }
  0xbb   : > { %489 = vst.msk [vmem:[#allocation3 + $0x38] sm:$0xff] %vm465_vm0, %v3953_v18  ;;  %490 = vst.msk [vmem:[#allocation3 + $0x40] sm:$0xff] %vm465_vm0, %v3953_v18 }
  0xbc   : > { %836 = vmax.xlane.bf16.xlu0 %v835_v10  ;;  %491 = vst.msk [vmem:[#allocation3 + $0x48] sm:$0xff] %vm465_vm0, %v3953_v18  ;;  %492 = vst.msk [vmem:[#allocation3 + $0x50] sm:$0xff] %vm465_vm0, %v3953_v18  ;;  %v3327_v10 = vld [vmem:[#allocation2 + $0x10] sm:$0xff]  ;;  %2520 = vmatpush3.bf16.msra.mxu1 %v2599_v7 }
  0xbd   : > { %493 = vst.msk [vmem:[#allocation3 + $0x58] sm:$0xff] %vm465_vm0, %v3953_v18  ;;  %494 = vst.msk [vmem:[#allocation3 + $0x60] sm:$0xff] %vm465_vm0, %v3953_v18  ;;  %2401 = vmatpush3.bf16.msra.mxu0 %v2599_v7  ;;  %2513 = vmatprep.subr.bf16.mxu1 %v2600_v23  ;;  %v3379_v7 = vld [vmem:[#allocation2 + $0x20] sm:$0xff] }
  0xbe   : > { %495 = vst.msk [vmem:[#allocation3 + $0x68] sm:$0xff] %vm465_vm0, %v3953_v18  ;;  %496 = vst.msk [vmem:[#allocation3 + $0x70] sm:$0xff] %vm465_vm0, %v3953_v18  ;;  %2402 = vmatprep.subr.bf16.mxu0 %v2600_v23 }
  0xc0   : > { %2521 = vmatpush3.bf16.msra.mxu1 %v2601_v12 }
  0xc1   : > { %839 = vmax.xlane.bf16.xlu1 %v838_v15  ;;  %2403 = vmatpush3.bf16.msra.mxu0 %v2601_v12  ;;  %v2604_v12 = vld [vmem:[%s3964_s0 + $0x40] sm:$0xff]  }
 0x131   : > { %v843_v26 = vpop.xlane.xlu0 %842 }
 0x132   : > { %v861_v30 = vunpack.c.l.bf16 %v843_v26  ;;  %v862_v29 = vunpack.c.h.bf16 %v843_v26 }
 0x134   : > { %v3256_v31 = vmax.f32 %v3251_v25, %v861_v30  ;;  %v3259_v32 = vmax.f32 %v3253_v16, %v862_v29 }
 0x136   : > { %1568 = vst.msk [vmem:[#allocation2 + $0x40] sm:$0xff] %vm465_vm0, %v3256_v31  ;;  %1569 = vst.msk [vmem:[#allocation2 + $0x48] sm:$0xff] %vm465_vm0, %v3259_v32  ;;  %v846_v41 = vpop.xlane.xlu1 %845  ;;  %v937_v44 = vpack.c.bf16 %v3259_v32, %v3256_v31 }
 0x137   : > { %v863_v45 = vunpack.c.l.bf16 %v846_v41  ;;  %v864_v46 = vunpack.c.h.bf16 %v846_v41 }
 0x138   : > { %963 = vperm.xlu0 %2588, %v937_v44  }
 0x139   : > { %v3278_v48 = vmax.f32 %v3269_v39, %v863_v45  ;;  %v3281_v49 = vmax.f32 %v3271_v40, %v864_v46  ;;  %v831_v51 = vpop.xlane.xlu0 %830  ;;  %v2602_v46 = vld [vmem:[%s3964_s0 + $0x48] sm:$0xff]  }
 0x13a   : > { %v853_v54 = vunpack.c.l.bf16 %v831_v51  ;;  %v854_v55 = vunpack.c.h.bf16 %v831_v51  ;;  %2514 = vmatprep.subr.bf16.mxu1 %v2602_v46  ;;  %2404 = vmatprep.subr.bf16.mxu0 %v2602_v46 }
 0x13b   : > { %1570 = vst.msk [vmem:[#allocation2 + $0x50] sm:$0xff] %vm465_vm0, %v3278_v48  ;;  %1571 = vst.msk [vmem:[#allocation2 + $0x58] sm:$0xff] %vm465_vm0, %v3281_v49  ;;  %v938_v58 = vpack.c.bf16 %v3281_v49, %v3278_v48  ;;  %2522 = vmatpush3.bf16.msra.mxu1 %v2603_v36  ;;  %2405 = vmatpush3.bf16.msra.mxu0 %v2603_v36 }
 0x13c   : > { %v3302_v59 = vmax.f32 %v3275_v47, %v853_v54  ;;  %v3305_v60 = vmax.f32 %v3283_v50, %v854_v55  ;;  %v3372_v54 = vld [vmem:[#allocation2 + $0x78] sm:$0xff]  ;;  %2515 = vmatprep.subr.bf16.mxu1 %v2604_v12  ;;  %2406 = vmatprep.subr.bf16.mxu0 %v2604_v12  ;;  %v3419_v12 = vld [vmem:[#allocation2 + $0x30] sm:$0xff] }
 0x13d   : > { %968 = vperm.xlu1 %2589, %v938_v58  }
 0x13e   : > { %1560 = vst.msk [vmem:[#allocation2] sm:$0xff] %vm465_vm0, %v3302_v59  ;;  %1561 = vst.msk [vmem:[#allocation2 + $0x8] sm:$0xff] %vm465_vm0, %v3305_v60  ;;  %v849_v3 = vpop.xlane.xlu1 %848  ;;  %v933_v4 = vpack.c.bf16 %v3305_v60, %v3302_v59 }
 0x13f   : > { %v865_v9 = vunpack.c.l.bf16 %v849_v3  ;;  %v866_v6 = vunpack.c.h.bf16 %v849_v3 }
 0x140   : > { %943 = vperm.xlu0 %2588, %v933_v4  }
 0x141   : > { %v3330_v15 = vmax.f32 %v3318_v0, %v865_v9  ;;  %v3333_v11 = vmax.f32 %v3320_v2, %v866_v6  ;;  %v834_v1 = vpop.xlane.xlu0 %833 }
 0x142   : > { %v855_v24 = vunpack.c.l.bf16 %v834_v1  ;;  %v856_v26 = vunpack.c.h.bf16 %v834_v1  ;;  %v3387_v1 = vld [vmem:[#allocation2 + $0x28] sm:$0xff] }
 0x143   : > { %1572 = vst.msk [vmem:[#allocation2 + $0x60] sm:$0xff] %vm465_vm0, %v3330_v15  ;;  %1573 = vst.msk [vmem:[#allocation2 + $0x68] sm:$0xff] %vm465_vm0, %v3333_v11  ;;  %v939_v41 = vpack.c.bf16 %v3333_v11, %v3330_v15 }
 0x144   : > { %v3354_v44 = vmax.f32 %v3327_v10, %v855_v24  ;;  %v3357_v45 = vmax.f32 %v3335_v22, %v856_v26  ;;  %v2605_v24 = vld [vmem:[%s3964_s0] sm:$0xff]  }
 0x145   : > { %973 = vperm.xlu1 %2589, %v939_v41   ;;  %2523 = vmatpush3.bf16.msra.mxu1 %v2605_v24 }
 0x146   : > { %1562 = vst.msk [vmem:[#allocation2 + $0x10] sm:$0xff] %vm465_vm0, %v3354_v44  ;;  %1563 = vst.msk [vmem:[#allocation2 + $0x18] sm:$0xff] %vm465_vm0, %v3357_v45  ;;  %v852_v55 = vpop.xlane.xlu1 %851  ;;  %v934_v58 = vpack.c.bf16 %v3357_v45, %v3354_v44  ;;  %2407 = vmatpush3.bf16.msra.mxu0 %v2605_v24  ;;  %2473 = vmatprep.subr.mxu1 %v3953_v18 }
 0x147   : > { %v867_v3 = vunpack.c.l.bf16 %v852_v55  ;;  %v868_v4 = vunpack.c.h.bf16 %v852_v55 }
 0x148   : > { %948 = vperm.xlu0 %2588, %v934_v58  }
 0x149   : > { %v3382_v9 = vmax.f32 %v3370_v52, %v867_v3  ;;  %v3385_v6 = vmax.f32 %v3372_v54, %v868_v4  ;;  %v837_v23 = vpop.xlane.xlu0 %836 }
 0x14a   : > { %v857_v26 = vunpack.c.l.bf16 %v837_v23  ;;  %v858_v41 = vunpack.c.h.bf16 %v837_v23 }
 0x14b   : > { %v900_v55 = vsub.f32 %v3372_v54, %v3385_v6  ;;  %1574 = vst.msk [vmem:[#allocation2 + $0x70] sm:$0xff] %vm465_vm0, %v3382_v9  ;;  %1575 = vst.msk [vmem:[#allocation2 + $0x78] sm:$0xff] %vm465_vm0, %v3385_v6  ;;  %v940_v58 = vpack.c.bf16 %v3385_v6, %v3382_v9  ;;  %v3967_v54 = vsub.f32 %v3269_v39, %v3278_v48 }
 0x14c   : > { %v3406_v36 = vmax.f32 %v3379_v7, %v857_v26  ;;  %v3409_v3 = vmax.f32 %v3387_v1, %v858_v41  ;;  %v3421_v26 = vld [vmem:[#allocation2 + $0x38] sm:$0xff]  ;;  %v3969_v39 = vsub.f32 %v3370_v52, %v3382_v9  ;;  %v3972_v52 = vsub.f32 %v3251_v25, %v3256_v31 }
 0x14d   : > { %978 = vperm.xlu1 %2589, %v940_v58   ;;  %v921_v6 = vmul.f32 1.442695, %v3967_v54 }
 0x14e   : > { %1564 = vst.msk [vmem:[#allocation2 + $0x20] sm:$0xff] %vm465_vm0, %v3406_v36  ;;  %1565 = vst.msk [vmem:[#allocation2 + $0x28] sm:$0xff] %vm465_vm0, %v3409_v3  ;;  %v840_v41 = vpop.xlane.xlu1 %839  ;;  %v935_v24 = vpack.c.bf16 %v3409_v3, %v3406_v36  ;;  %v929_v48 = vmul.f32 1.442695, %v3969_v39  ;;  %v917_v9 = vmul.f32 1.442695, %v3972_v52  ;;  %v3975_v31 = vsub.f32 %v3387_v1, %v3409_v3 }
 0x14f   : > { %v859_v58 = vunpack.c.l.bf16 %v840_v41  ;;  %v860_v28 = vunpack.c.h.bf16 %v840_v41  ;;  %v3978_v1 = vsub.f32 %v3327_v10, %v3354_v44  ;;  %v1052_v39 = vld [vmem:[#allocation3 + $0x38] sm:$0xff] }
 0x150   : > { %953 = vperm.xlu0 %2588, %v935_v24  }
 0x151   : > { %v3427_v63 = vmax.f32 %v3419_v12, %v859_v58  ;;  %v3430_v51 = vmax.f32 %v3421_v26, %v860_v28  ;;  %v905_v3 = vmul.f32 1.442695, %v3978_v1 }
 0x153   : > { %1566 = vst.msk [vmem:[#allocation2 + $0x30] sm:$0xff] %vm465_vm0, %v3427_v63  ;;  %1567 = vst.msk [vmem:[#allocation2 + $0x38] sm:$0xff] %vm465_vm0, %v3430_v51  ;;  %v936_v41 = vpack.c.bf16 %v3430_v51, %v3427_v63 }
 0x155   : > { %958 = vperm.xlu1 %2589, %v936_v41  }
 0x1b3   : > { %v964_v24 = vpop.permute.xlu0 %963 }
 0x1b4   : > { %v989_v28 = vsub.bf16 %v3098_v61, %v964_v24  ;;  %v990_v58 = vsub.bf16 %v3102_v62, %v964_v24 }
 0x1b6   : > { %v1022_v23 = vmul.bf16 1069105081, %v989_v28  ;;  %v1025_v33 = vmul.bf16 1069105081, %v990_v58 }
 0x1b8   : > { %2606 = vpow.bf16 %v1022_v23  ;;  %v969_v35 = vpop.permute.xlu1 %968 }
 0x1b9   : > { %2608 = vpow.bf16 %v1025_v33  ;;  %v992_v4 = vsub.bf16 %v3133_v19, %v969_v35  ;;  %v991_v38 = vsub.bf16 %v3124_v17, %v969_v35 }
 0x1bb   : > { %v1031_v57 = vmul.bf16 1069105081, %v992_v4  ;;  %v944_v46 = vpop.permute.xlu0 %943  ;;  %v1028_v56 = vmul.bf16 1069105081, %v991_v38 }
 0x1bc   : > { %v981_v18 = vsub.bf16 %v3137_v20, %v944_v46  ;;  %v982_v41 = vsub.bf16 %v3143_v21, %v944_v46 }
 0x1bd   : > { %2610 = vpow.bf16 %v1031_v57 }
 0x1be   : > { %v998_v61 = vmul.bf16 1069105081, %v981_v18  ;;  %v1001_v30 = vmul.bf16 1069105081, %v982_v41 }
 0x1c0   : > { %2612 = vpow.bf16 %v998_v61  ;;  %v974_v62 = vpop.permute.xlu1 %973 }
 0x1c1   : > { %2614 = vpow.bf16 %v1001_v30  ;;  %v994_v23 = vsub.bf16 %v3160_v43, %v974_v62  ;;  %v993_v19 = vsub.bf16 %v3156_v42, %v974_v62 }
 0x1c2   : > { %2616 = vpow.bf16 %v1028_v56 }
 0x1c3   : > { %v1037_v33 = vmul.bf16 1069105081, %v994_v23  ;;  %v949_v17 = vpop.permute.xlu0 %948  ;;  %v1034_v21 = vmul.bf16 1069105081, %v993_v19 }
 0x1c4   : > { %v983_v35 = vsub.bf16 %v3169_v34, %v949_v17  ;;  %v984_v20 = vsub.bf16 %v3173_v53, %v949_v17 }
 0x1c5   : > { %2618 = vpow.bf16 %v1037_v33 }
 0x1c6   : > { %v3452_v4 = vpop.eup %2606  ;;  %v1004_v18 = vmul.bf16 1069105081, %v983_v35  ;;  %v1007_v38 = vmul.bf16 1069105081, %v984_v20 }
 0x1c7   : > { %v3454_v57 = vpop.eup %2608 }
 0x1c8   : > { %2620 = vpow.bf16 %v1004_v18  ;;  %1494 = vmatprep.mubr.bf16.mxu1 %v3454_v57  ;;  %v979_v43 = vpop.permute.xlu1 %978 }
 0x1c9   : > { %2622 = vpow.bf16 %v1007_v38  ;;  %v995_v42 = vsub.bf16 %v3181_v37, %v979_v43  ;;  %v996_v56 = vsub.bf16 %v3185_v27, %v979_v43  ;;  %1495 = vmatmul.mubr.bf16.vlgmr.msra.gmra.mxu1 %v3452_v4 }
 0x1ca   : > { %2624 = vpow.bf16 %v1034_v21 }
 0x1cb   : > { %v1040_v34 = vmul.bf16 1069105081, %v995_v42  ;;  %v1043_v53 = vmul.bf16 1069105081, %v996_v56  ;;  %v954_v30 = vpop.permute.xlu0 %953  ;;  %v3460_v46 = vpop.eup %2610 }
 0x1cc   : > { %v985_v24 = vsub.bf16 %v3189_v8, %v954_v30  ;;  %v986_v28 = vsub.bf16 %v3191_v5, %v954_v30  ;;  %1502 = vmatprep.mubr.bf16.mxu1 %v3460_v46 }
 0x1cd   : > { %2626 = vpow.bf16 %v1040_v34  ;;  %v1100_v34 = vunpack.c.h.bf16 %v3460_v46 }
 0x1ce   : > { %v3465_v58 = vpop.eup %2612  ;;  %2628 = vpow.bf16 %v1043_v53  ;;  %v1010_v37 = vmul.bf16 1069105081, %v985_v24  ;;  %v1013_v27 = vmul.bf16 1069105081, %v986_v28 }
 0x1cf   : > { %v3467_v41 = vpop.eup %2614 }
 0x1d0   : > { %v3469_v61 = vpop.eup %2616  ;;  %2630 = vpow.bf16 %v1010_v37  ;;  %1462 = vmatprep.mubr.bf16.mxu0 %v3467_v41  ;;  %v959_v62 = vpop.permute.xlu1 %958 }
 0x1d1   : > { %2632 = vpow.bf16 %v1013_v27  ;;  %v987_v8 = vsub.bf16 %v3195_v13, %v959_v62  ;;  %v988_v5 = vsub.bf16 %v3197_v14, %v959_v62  ;;  %1463 = vmatmul.mubr.bf16.vlgmr.msra.gmra.mxu0 %v3465_v58  ;;  %1503 = vmatmul.mubr.bf16.gmra.mxu1 %v3469_v61  ;;  %v1099_v56 = vunpack.c.h.bf16 %v3469_v61 }
 0x1d2   : > { %v1095_v27 = vunpack.c.h.bf16 %v3452_v4  ;;  %v1096_v62 = vunpack.c.h.bf16 %v3454_v57 }
 0x1d3   : > { %v1016_v23 = vmul.bf16 1069105081, %v987_v8  ;;  %v1019_v19 = vmul.bf16 1069105081, %v988_v5  ;;  %v2619_v33 = vpop.eup %2618 }
 0x1d4   : > { %1510 = vmatprep.mubr.bf16.mxu1 %v2619_v33  ;;  %v1104_v37 = vunpack.c.h.bf16 %v2619_v33 }
 0x1d5   : > { %2634 = vpow.bf16 %v1016_v23  ;;  %v1142_v23 = vadd.f32 %v1100_v34, %v1099_v56 }
 0x1d6   : > { %v3476_v17 = vpop.eup %2620  ;;  %2636 = vpow.bf16 %v1019_v19 }
 0x1d7   : > { %v3478_v35 = vpop.eup %2622 }
 0x1d8   : > { %v2625_v20 = vpop.eup %2624  ;;  %1470 = vmatprep.mubr.bf16.mxu0 %v3478_v35 }
 0x1d9   : > { %1471 = vmatmul.mubr.bf16.gmra.mxu0 %v3476_v17  ;;  %1511 = vmatmul.mubr.bf16.gmra.mxu1 %v2625_v20  ;;  %v1103_v28 = vunpack.c.h.bf16 %v2625_v20  ;;  %v1101_v19 = vunpack.c.l.bf16 %v2625_v20  ;;  %v1094_v20 = vunpack.c.l.bf16 %v3454_v57  ;;  %v1080_v57 = vunpack.c.h.bf16 %v3467_v41 }
 0x1db   : > { %v2627_v13 = vpop.eup %2626  ;;  %v1148_v5 = vadd.f32 %v1104_v37, %v1103_v28 }
 0x1dc   : > { %v2629_v14 = vpop.eup %2628  ;;  %v1107_v21 = vunpack.c.h.bf16 %v2627_v13  ;;  %v1105_v18 = vunpack.c.l.bf16 %v2627_v13 }
 0x1dd   : > { %1518 = vmatprep.mubr.bf16.mxu1 %v2629_v14  ;;  %v1108_v38 = vunpack.c.h.bf16 %v2629_v14  ;;  %v1106_v43 = vunpack.c.l.bf16 %v2629_v14  ;;  %v1102_v14 = vunpack.c.l.bf16 %v2619_v33 }
 0x1de   : > { %v2631_v42 = vpop.eup %2630 }
 0x1df   : > { %v2633_v53 = vpop.eup %2632  ;;  %v1154_v30 = vadd.f32 %v1108_v38, %v1107_v21  ;;  %v1151_v24 = vadd.f32 %v1106_v43, %v1105_v18  ;;  %v1136_v21 = vadd.f32 %v1096_v62, %v1095_v27  ;;  %v1097_v18 = vunpack.c.l.bf16 %v3469_v61 }
 0x1e0   : > { %1478 = vmatprep.mubr.bf16.mxu0 %v2633_v53  ;;  %v1145_v38 = vadd.f32 %v1102_v14, %v1101_v19  ;;  %v1098_v43 = vunpack.c.l.bf16 %v3460_v46  ;;  %v1087_v34 = vunpack.c.h.bf16 %v2631_v42  ;;  %v1088_v28 = vunpack.c.h.bf16 %v2633_v53 }
 0x1e1   : > { %1155 = vadd.xlane.f32.xlu0 %v1154_v30  ;;  %1152 = vadd.xlane.f32.xlu1 %v1151_v24  ;;  %v1093_v24 = vunpack.c.l.bf16 %v3452_v4  ;;  %v1083_v61 = vunpack.c.h.bf16 %v3476_v17  ;;  %v1084_v46 = vunpack.c.h.bf16 %v3478_v35  ;;  %v1079_v4 = vunpack.c.h.bf16 %v3465_v58 }
 0x1e2   : > { %1479 = vmatmul.mubr.bf16.gmra.mxu0 %v2631_v42  ;;  %1519 = vmatmul.mubr.bf16.gmra.mxu1 %v2627_v13  ;;  %v1139_v33 = vadd.f32 %v1098_v43, %v1097_v18  ;;  %v1124_v27 = vadd.f32 %v1088_v28, %v1087_v34  ;;  %v1085_v14 = vunpack.c.l.bf16 %v2631_v42  ;;  %v1081_v43 = vunpack.c.l.bf16 %v3476_v17 }
 0x1e3   : > { %v2635_v8 = vpop.eup %2634  ;;  %v1133_v37 = vadd.f32 %v1094_v20, %v1093_v24  ;;  %v1112_v18 = vadd.f32 %v1080_v57, %v1079_v4  ;;  %v1078_v42 = vunpack.c.l.bf16 %v3467_v41  ;;  %v911_v28 = vmul.f32 1.442695, %v3975_v31 }
 0x1e4   : > { %v2637_v29 = vpop.eup %2636  ;;  %v1091_v13 = vunpack.c.h.bf16 %v2635_v8  ;;  %v1089_v62 = vunpack.c.l.bf16 %v2635_v8 }
 0x1e5   : > { %1149 = vadd.xlane.f32.xlu0 %v1148_v5  ;;  %1143 = vadd.xlane.f32.xlu1 %v1142_v23  ;;  %v1092_v30 = vunpack.c.h.bf16 %v2637_v29  ;;  %v1090_v5 = vunpack.c.l.bf16 %v2637_v29  ;;  %v1118_v23 = vadd.f32 %v1084_v46, %v1083_v61 }
 0x1e6   : > { %1486 = vmatprep.mubr.bf16.mxu0 %v2637_v29  ;;  %v931_v29 = vmul.f32 1.442695, %v900_v55  ;;  %v3968_v55 = vmov 0.0  }
 0x1e7   : > { %v1130_v56 = vadd.f32 %v1092_v30, %v1091_v13  ;;  %v1127_v19 = vadd.f32 %v1090_v5, %v1089_v62  ;;  %v1082_v13 = vunpack.c.l.bf16 %v3478_v35  ;;  %v1077_v30 = vunpack.c.l.bf16 %v3465_v58  ;;  %514 = vst.msk [vmem:[#allocation4 + $0x78] sm:$0xff] %vm498_vm9, %v3968_v55  ;;  %499 = vst.msk [vmem:[#allocation4] sm:$0xff] %vm498_vm9, %v3968_v55  ;;  %v1059_v5 = vld [vmem:[#allocation3 + $0x70] sm:$0xff] }
 0x1e8   : > { %2638 = vpow2.f32 %v931_v29  ;;  %v3966_v35 = vsub.f32 %v3318_v0, %v3330_v15  ;;  %500 = vst.msk [vmem:[#allocation4 + $0x8] sm:$0xff] %vm498_vm9, %v3968_v55  ;;  %501 = vst.msk [vmem:[#allocation4 + $0x10] sm:$0xff] %vm498_vm9, %v3968_v55  ;;  %v3971_v58 = vsub.f32 %v3253_v16, %v3259_v32 }
 0x1e9   : > { %1146 = vadd.xlane.f32.xlu0 %v1145_v38  ;;  %1137 = vadd.xlane.f32.xlu1 %v1136_v21  ;;  %v1086_v21 = vunpack.c.l.bf16 %v2633_v53  ;;  %v3965_v53 = vsub.f32 %v3320_v2, %v3333_v11  ;;  %v1109_v17 = vadd.f32 %v1078_v42, %v1077_v30  ;;  %502 = vst.msk [vmem:[#allocation4 + $0x18] sm:$0xff] %vm498_vm9, %v3968_v55  ;;  %503 = vst.msk [vmem:[#allocation4 + $0x20] sm:$0xff] %vm498_vm9, %v3968_v55  ;;  %v1057_v30 = vld [vmem:[#allocation3 + $0x60] sm:$0xff]  ;;  %v1054_v42 = vld [vmem:[#allocation3 + $0x48] sm:$0xff] }
 0x1ea   : > { %1487 = vmatmul.mubr.bf16.gmra.mxu0 %v2635_v8  ;;  %v1115_v8 = vadd.f32 %v1082_v13, %v1081_v43  ;;  %v925_v20 = vmul.f32 1.442695, %v3966_v35  ;;  %504 = vst.msk [vmem:[#allocation4 + $0x28] sm:$0xff] %vm498_vm9, %v3968_v55  ;;  %505 = vst.msk [vmem:[#allocation4 + $0x30] sm:$0xff] %vm498_vm9, %v3968_v55  ;;  %v3970_v2 = vsub.f32 %v3271_v40, %v3281_v49  ;;  %v919_v41 = vmul.f32 1.442695, %v3971_v58 }
 0x1eb   : > { %v1121_v38 = vadd.f32 %v1086_v21, %v1085_v14  ;;  %v927_v24 = vmul.f32 1.442695, %v3965_v53  ;;  %506 = vst.msk [vmem:[#allocation4 + $0x38] sm:$0xff] %vm498_vm9, %v3968_v55  ;;  %507 = vst.msk [vmem:[#allocation4 + $0x40] sm:$0xff] %vm498_vm9, %v3968_v55  ;;  %v3973_v49 = vsub.f32 %v3421_v26, %v3430_v51  ;;  %v3976_v51 = vsub.f32 %v3379_v7, %v3406_v36  ;;  %v1058_v14 = vld [vmem:[#allocation3 + $0x68] sm:$0xff]  ;;  %v1056_v21 = vld [vmem:[#allocation3 + $0x58] sm:$0xff] }
 0x1ec   : > { %508 = vst.msk [vmem:[#allocation4 + $0x48] sm:$0xff] %vm498_vm9, %v3968_v55  ;;  %509 = vst.msk [vmem:[#allocation4 + $0x50] sm:$0xff] %vm498_vm9, %v3968_v55  ;;  %v923_v15 = vmul.f32 1.442695, %v3970_v2  ;;  %v3979_v7 = vsub.f32 %v3283_v50, %v3305_v60 }
 0x1ed   : > { %1140 = vadd.xlane.f32.xlu0 %v1139_v33  ;;  %1131 = vadd.xlane.f32.xlu1 %v1130_v56  ;;  %2640 = vpow2.f32 %v927_v24  ;;  %510 = vst.msk [vmem:[#allocation4 + $0x58] sm:$0xff] %vm498_vm9, %v3968_v55  ;;  %511 = vst.msk [vmem:[#allocation4 + $0x60] sm:$0xff] %vm498_vm9, %v3968_v55  ;;  %v915_v16 = vmul.f32 1.442695, %v3973_v49  ;;  %v3974_v56 = vsub.f32 %v3419_v12, %v3427_v63  ;;  %v909_v26 = vmul.f32 1.442695, %v3976_v51 }
 0x1ee   : > { %2642 = vpow2.f32 %v925_v20  ;;  %512 = vst.msk [vmem:[#allocation4 + $0x68] sm:$0xff] %vm498_vm9, %v3968_v55  ;;  %513 = vst.msk [vmem:[#allocation4 + $0x70] sm:$0xff] %vm498_vm9, %v3968_v55  ;;  %v3977_v63 = vsub.f32 %v3335_v22, %v3357_v45  ;;  %v903_v36 = vmul.f32 1.442695, %v3979_v7  ;;  %v3980_v22 = vsub.f32 %v3275_v47, %v3302_v59  ;;  %v1060_v59 = vld [vmem:[#allocation3 + $0x78] sm:$0xff]  ;;  %v1050_v49 = vld [vmem:[#allocation3 + $0x28] sm:$0xff] }
 0x1ef   : > { %2644 = vpow2.f32 %v921_v6  ;;  %v913_v34 = vmul.f32 1.442695, %v3974_v56  ;;  %v1055_v6 = vld [vmem:[#allocation3 + $0x50] sm:$0xff]  ;;  %v1048_v51 = vld [vmem:[#allocation3 + $0x18] sm:$0xff] }
 0x1f0   : > { %2646 = vpow2.f32 %v929_v48  ;;  %v907_v12 = vmul.f32 1.442695, %v3977_v63  ;;  %v901_v45 = vmul.f32 1.442695, %v3980_v22 }
 0x1f1   : > { %1134 = vadd.xlane.f32.xlu0 %v1133_v37  ;;  %1125 = vadd.xlane.f32.xlu1 %v1124_v27  ;;  %2648 = vpow2.f32 %v923_v15 }
 0x1f2   : > { %2650 = vpow2.f32 %v919_v41 }
 0x1f3   : > { %2652 = vpow2.f32 %v917_v9 }
 0x1f4   : > { %2654 = vpow2.f32 %v915_v16 }
 0x1f5   : > { %1119 = vadd.xlane.f32.xlu1 %v1118_v23  ;;  %1128 = vadd.xlane.f32.xlu0 %v1127_v19  ;;  %v2639_v0 = vpop.eup %2638  ;;  %2656 = vpow2.f32 %v913_v34 }
 0x1f6   : > { %2658 = vpow2.f32 %v911_v28  ;;  %v1076_v4 = vmul.f32 %v2639_v0, %v1060_v59 }
 0x1f7   : > { %2660 = vpow2.f32 %v909_v26 }
 0x1f8   : > { %2662 = vpow2.f32 %v907_v12 }
 0x1f9   : > { %1113 = vadd.xlane.f32.xlu1 %v1112_v18  ;;  %1122 = vadd.xlane.f32.xlu0 %v1121_v38  ;;  %2664 = vpow2.f32 %v905_v3 }
 0x1fa   : > { %v3548_v11 = vpop.eup %2640  ;;  %2666 = vpow2.f32 %v903_v36  ;;  %v1049_v36 = vld [vmem:[#allocation3 + $0x20] sm:$0xff] }
 0x1fb   : > { %v3554_v33 = vpop.eup %2642  ;;  %2668 = vpow2.f32 %v901_v45  ;;  %v1074_v43 = vmul.f32 %v3548_v11, %v1058_v14 }
 0x1fc   : > { %v3560_v40 = vpop.eup %2644 }
 0x1fd   : > { %1116 = vadd.xlane.f32.xlu0 %v1115_v8  ;;  %v2647_v32 = vpop.eup %2646 }
 0x1fe   : > { %v2649_v25 = vpop.eup %2648  ;;  %v1075_v57 = vmul.f32 %v2647_v32, %v1059_v5 }
 0x1ff   : > { %v2651_v37 = vpop.eup %2650  ;;  %v1072_v13 = vmul.f32 %v2649_v25, %v1056_v21 }
 0x200   : > { %v3575_v61 = vpop.eup %2652  ;;  %v1070_v35 = vmul.f32 %v2651_v37, %v1054_v42 }
 0x201   : > { %1110 = vadd.xlane.f32.xlu0 %v1109_v17  ;;  %v2655_v27 = vpop.eup %2654  ;;  %v1073_v17 = vmul.f32 %v3554_v33, %v1057_v30 }
 0x202   : > { %v3584_v46 = vpop.eup %2656  ;;  %v1068_v58 = vmul.f32 %v2655_v27, %v1052_v39 }
 0x203   : > { %v3590_v62 = vpop.eup %2658 }
 0x204   : > { %v3596_v10 = vpop.eup %2660  ;;  %v1066_v31 = vmul.f32 %v3590_v62, %v1050_v49 }
 0x205   : > { %v3599_v44 = vpop.eup %2662 }
 0x206   : > { %v3602_v50 = vpop.eup %2664  ;;  %v1064_v3 = vmul.f32 %v3599_v44, %v1048_v51 }
 0x207   : > { %v3605_v60 = vpop.eup %2666 }
 0x208   : > { %v3608_v47 = vpop.eup %2668 }
 0x20a   : > { %1283 = vperm.xlu1 %2589, %v2639_v0  }
 0x20e   : > { %1273 = vperm.xlu1 %2589, %v3548_v11   ;;  %v1071_v11 = vmul.f32 %v3560_v40, %v1055_v6 }
 0x212   : > { %1268 = vperm.xlu1 %2589, %v3554_v33   ;;  %v1053_v33 = vld [vmem:[#allocation3 + $0x40] sm:$0xff] }
 0x216   : > { %1258 = vperm.xlu1 %2589, %v3560_v40  }
 0x217   : > { %1278 = vperm.xlu0 %2588, %v2647_v32  }
 0x21b   : > { %1263 = vperm.xlu0 %2588, %v2649_v25   ;;  %v1069_v25 = vmul.f32 %v3575_v61, %v1053_v33 }
 0x21f   : > { %1253 = vperm.xlu0 %2588, %v2651_v37   ;;  %v1051_v37 = vld [vmem:[#allocation3 + $0x30] sm:$0xff] }
 0x220   : > { %v1067_v1 = vmul.f32 %v3584_v46, %v1051_v37 }
 0x223   : > { %1248 = vperm.xlu0 %2588, %v3575_v61  }
 0x227   : > { %1243 = vperm.xlu0 %2588, %v2655_v27  }
 0x22b   : > { %1238 = vperm.xlu0 %2588, %v3584_v46  }
 0x22f   : > { %1233 = vperm.xlu0 %2588, %v3590_v62   ;;  %v1046_v62 = vld [vmem:[#allocation3 + $0x8] sm:$0xff] }
 0x233   : > { %1228 = vperm.xlu0 %2588, %v3596_v10  }
 0x237   : > { %1223 = vperm.xlu0 %2588, %v3599_v44   ;;  %v1047_v44 = vld [vmem:[#allocation3 + $0x10] sm:$0xff] }
 0x23b   : > { %1218 = vperm.xlu0 %2588, %v3602_v50  }
 0x23f   : > { %1213 = vperm.xlu0 %2588, %v3605_v60  }
 0x243   : > { %1208 = vperm.xlu0 %2588, %v3608_v47  }
 0x26a   : > { %v1156_v23 = vpop.xlane.xlu0 %1155  ;;  %v1153_v19 = vpop.xlane.xlu1 %1152 }
 0x26b   : > { %v1172_v18 = vadd.f32 %v1156_v23, %v1076_v4  ;;  %v1171_v38 = vadd.f32 %v1153_v19, %v1075_v57  ;;  %v1065_v4 = vmul.f32 %v3596_v10, %v1049_v36  ;;  %v1062_v57 = vmul.f32 %v3605_v60, %v1046_v62 }
 0x26d   : > { %1189 = vst.msk [vmem:[#allocation3 + $0x78] sm:$0xff] %vm465_vm0, %v1172_v18  ;;  %1188 = vst.msk [vmem:[#allocation3 + $0x70] sm:$0xff] %vm465_vm0, %v1171_v38 }
 0x26e   : > { %v1150_v29 = vpop.xlane.xlu0 %1149  ;;  %v1144_v8 = vpop.xlane.xlu1 %1143 }
 0x26f   : > { %v1170_v53 = vadd.f32 %v1150_v29, %v1074_v43  ;;  %v1168_v24 = vadd.f32 %v1144_v8, %v1072_v13  ;;  %v1063_v13 = vmul.f32 %v3602_v50, %v1047_v44  ;;  %v1045_v8 = vld [vmem:[#allocation3] sm:$0xff] }
 0x271   : > { %1187 = vst.msk [vmem:[#allocation3 + $0x68] sm:$0xff] %vm465_vm0, %v1170_v53  ;;  %1185 = vst.msk [vmem:[#allocation3 + $0x58] sm:$0xff] %vm465_vm0, %v1168_v24 }
 0x272   : > { %v1147_v20 = vpop.xlane.xlu0 %1146  ;;  %v1138_v54 = vpop.xlane.xlu1 %1137 }
 0x273   : > { %v1169_v48 = vadd.f32 %v1147_v20, %v1073_v17  ;;  %v1166_v0 = vadd.f32 %v1138_v54, %v1070_v35  ;;  %v1061_v20 = vmul.f32 %v3608_v47, %v1045_v8 }
 0x274   : > { %v1594_v2 = vld [vmem:[#allocation3 + $0x78] sm:$0xff]  ;;  %v1593_v15 = vld [vmem:[#allocation3 + $0x70] sm:$0xff] }
 0x275   : > { %1186 = vst.msk [vmem:[#allocation3 + $0x60] sm:$0xff] %vm465_vm0, %v1169_v48  ;;  %1183 = vst.msk [vmem:[#allocation3 + $0x48] sm:$0xff] %vm465_vm0, %v1166_v0  ;;  %v1610_v41 = vmax.f32 %v1594_v2, 1e-20  ;;  %v1609_v56 = vmax.f32 %v1593_v15, 1e-20 }
 0x276   : > { %v1141_v52 = vpop.xlane.xlu0 %1140  ;;  %v1132_v9 = vpop.xlane.xlu1 %1131 }
 0x277   : > { %v1167_v16 = vadd.f32 %v1141_v52, %v1071_v11  ;;  %v1164_v32 = vadd.f32 %v1132_v9, %v1068_v58  ;;  %2670 = vrcp.f32 %v1610_v41 }
 0x278   : > { %v1592_v34 = vld [vmem:[#allocation3 + $0x68] sm:$0xff]  ;;  %2672 = vrcp.f32 %v1609_v56  ;;  %v1590_v5 = vld [vmem:[#allocation3 + $0x58] sm:$0xff]  ;;  %v1200_v56 = vld [vmem:[#allocation4 + $0x50] sm:$0xff] }
 0x279   : > { %1184 = vst.msk [vmem:[#allocation3 + $0x50] sm:$0xff] %vm465_vm0, %v1167_v16  ;;  %1181 = vst.msk [vmem:[#allocation3 + $0x38] sm:$0xff] %vm465_vm0, %v1164_v32  ;;  %v1608_v12 = vmax.f32 %v1592_v34, 1e-20  ;;  %v1606_v19 = vmax.f32 %v1590_v5, 1e-20 }
 0x27a   : > { %v1135_v40 = vpop.xlane.xlu0 %1134  ;;  %v1126_v28 = vpop.xlane.xlu1 %1125 }
 0x27b   : > { %v1165_v26 = vadd.f32 %v1135_v40, %v1069_v25  ;;  %v1162_v63 = vadd.f32 %v1126_v28, %v1066_v31  ;;  %2674 = vrcp.f32 %v1608_v12 }
 0x27c   : > { %v1591_v27 = vld [vmem:[#allocation3 + $0x60] sm:$0xff]  ;;  %v1588_v53 = vld [vmem:[#allocation3 + $0x48] sm:$0xff] }
 0x27d   : > { %1182 = vst.msk [vmem:[#allocation3 + $0x40] sm:$0xff] %vm465_vm0, %v1165_v26  ;;  %1179 = vst.msk [vmem:[#allocation3 + $0x28] sm:$0xff] %vm465_vm0, %v1162_v63  ;;  %v1607_v59 = vmax.f32 %v1591_v27, 1e-20  ;;  %v1604_v39 = vmax.f32 %v1588_v53, 1e-20 }
 0x27e   : > { %v1129_v61 = vpop.xlane.xlu0 %1128  ;;  %v1120_v7 = vpop.xlane.xlu1 %1119  ;;  %v1198_v53 = vld [vmem:[#allocation4 + $0x40] sm:$0xff] }
 0x27f   : > { %v1163_v22 = vadd.f32 %v1129_v61, %v1067_v1  ;;  %v1160_v45 = vadd.f32 %v1120_v7, %v1064_v3  ;;  %2676 = vrcp.f32 %v1607_v59  ;;  %v1201_v3 = vld [vmem:[#allocation4 + $0x58] sm:$0xff] }
 0x280   : > { %v1589_v18 = vld [vmem:[#allocation3 + $0x50] sm:$0xff]  ;;  %2678 = vrcp.f32 %v1606_v19  ;;  %v1586_v49 = vld [vmem:[#allocation3 + $0x38] sm:$0xff] }
 0x281   : > { %1180 = vst.msk [vmem:[#allocation3 + $0x30] sm:$0xff] %vm465_vm0, %v1163_v22  ;;  %1177 = vst.msk [vmem:[#allocation3 + $0x18] sm:$0xff] %vm465_vm0, %v1160_v45  ;;  %v1605_v30 = vmax.f32 %v1589_v18, 1e-20  ;;  %v1602_v37 = vmax.f32 %v1586_v49, 1e-20 }
 0x282   : > { %v1123_v46 = vpop.xlane.xlu0 %1122  ;;  %v1114_v23 = vpop.xlane.xlu1 %1113 }
 0x283   : > { %v1161_v14 = vadd.f32 %v1123_v46, %v1065_v4  ;;  %v1158_v21 = vadd.f32 %v1114_v23, %v1062_v57  ;;  %v1199_v57 = vld [vmem:[#allocation4 + $0x48] sm:$0xff]  ;;  %v1202_v23 = vld [vmem:[#allocation4 + $0x60] sm:$0xff] }
 0x284   : > { %v2671_v38 = vpop.eup %2670  ;;  %v1584_v43 = vld [vmem:[#allocation3 + $0x28] sm:$0xff]  ;;  %v1587_v11 = vld [vmem:[#allocation3 + $0x40] sm:$0xff] }
 0x285   : > { %1178 = vst.msk [vmem:[#allocation3 + $0x20] sm:$0xff] %vm465_vm0, %v1161_v14  ;;  %1175 = vst.msk [vmem:[#allocation3 + $0x8] sm:$0xff] %vm465_vm0, %v1158_v21  ;;  %1720 = vperm.xlu1 %2589, %v2671_v38   ;;  %v1600_v10 = vmax.f32 %v1584_v43, 1e-20  ;;  %v2673_v24 = vpop.eup %2672  ;;  %v1603_v9 = vmax.f32 %v1587_v11, 1e-20 }
 0x286   : > { %v1117_v29 = vpop.xlane.xlu0 %1116  ;;  %v3635_v60 = vpop.permute.xlu1 %1283 }
 0x287   : > { %v1159_v42 = vadd.f32 %v1117_v29, %v1063_v13  ;;  %2680 = vrcp.f32 %v1600_v10 }
 0x288   : > { %v1582_v17 = vld [vmem:[#allocation3 + $0x18] sm:$0xff]  ;;  %2682 = vrcp.f32 %v1605_v30  ;;  %v2675_v2 = vpop.eup %2674  ;;  %v1585_v12 = vld [vmem:[#allocation3 + $0x30] sm:$0xff] }
 0x289   : > { %1176 = vst.msk [vmem:[#allocation3 + $0x10] sm:$0xff] %vm465_vm0, %v1159_v42  ;;  %1715 = vperm.xlu1 %2589, %v2673_v24   ;;  %v3638_v35 = vpop.f32.mrf.mxu1  ;;  %v1598_v50 = vmax.f32 %v1582_v17, 1e-20  ;;  %v1601_v45 = vmax.f32 %v1585_v12, 1e-20  ;;  %v1203_v17 = vld [vmem:[#allocation4 + $0x68] sm:$0xff] }
 0x28a   : > { %v1111_v54 = vpop.xlane.xlu0 %1110  ;;  %v3641_v6 = vpop.permute.xlu1 %1273 }
 0x28b   : > { %v1157_v48 = vadd.f32 %v1111_v54, %v1061_v20  ;;  %v3643_v0 = vpop.f32.mrf.mxu1  ;;  %2684 = vrcp.f32 %v1598_v50 }
 0x28c   : > { %v1580_v15 = vld [vmem:[#allocation3 + $0x8] sm:$0xff]  ;;  %2686 = vrcp.f32 %v1604_v39  ;;  %v2677_v33 = vpop.eup %2676  ;;  %v1583_v46 = vld [vmem:[#allocation3 + $0x20] sm:$0xff] }
 0x28d   : > { %1174 = vst.msk [vmem:[#allocation3] sm:$0xff] %vm465_vm0, %v1157_v48  ;;  %1710 = vperm.xlu1 %2589, %v2675_v2   ;;  %v2435_v58 = vpop.f32.mrf.mxu1  ;;  %v1596_v41 = vmax.f32 %v1580_v15, 1e-20  ;;  %v2679_v31 = vpop.eup %2678  ;;  %v1599_v29 = vmax.f32 %v1583_v46, 1e-20  ;;  %v2434_v2 = vadd.f32 %v3643_v0, %v3638_v35  ;;  %vm2877_vm0 = vmmov 0  }
 0x28e   : > { %v1269_v52 = vpop.permute.xlu1 %1268  ;;  %2505 = vmatprep.mubr.msk.f32.mxu1 %vm2877_vm0, %v3968_v55 }
 0x28f   : > { %v2436_v47 = vpop.f32.mrf.mxu1  ;;  %2688 = vrcp.f32 %v1596_v41  ;;  %v1298_v30 = vmul.f32 %v1269_v52, %v1202_v23 }
 0x290   : > { %2690 = vrcp.f32 %v1603_v9  ;;  %v2437_v38 = vadd.f32 %v2436_v47, %v2435_v58  ;;  %v1581_v24 = vld [vmem:[#allocation3 + $0x10] sm:$0xff]  ;;  %v1299_v47 = vmul.f32 %v3641_v6, %v1203_v17 }
 0x291   : > { %1705 = vperm.xlu1 %2589, %v2677_v33   ;;  %v3646_v16 = vpop.f32.mrf.mxu0  ;;  %v2438_v32 = vpop.f32.mrf.mxu1  ;;  %2692 = vrcp.f32 %v1602_v37  ;;  %v1597_v41 = vmax.f32 %v1581_v24, 1e-20 }
 0x292   : > { %v3648_v34 = vpop.permute.xlu0 %1278  ;;  %v1259_v25 = vpop.permute.xlu1 %1258  ;;  %2694 = vrcp.f32 %v1601_v45 }
 0x293   : > { %v3650_v40 = vpop.f32.mrf.mxu0  ;;  %v2439_v28 = vpop.f32.mrf.mxu1  ;;  %v1296_v26 = vmul.f32 %v1259_v25, %v1200_v56  ;;  %2696 = vrcp.f32 %v1599_v29 }
 0x294   : > { %v2681_v51 = vpop.eup %2680  ;;  %v2440_v63 = vadd.f32 %v2439_v28, %v2438_v32  ;;  %v1579_v33 = vld [vmem:[#allocation3] sm:$0xff]  ;;  %v1204_v32 = vld [vmem:[#allocation4 + $0x70] sm:$0xff]  ;;  %2698 = vrcp.f32 %v1597_v41 }
 0x295   : > { %1700 = vperm.xlu1 %2589, %v2679_v31   ;;  %1670 = vperm.xlu0 %2588, %v2681_v51   ;;  %v3652_v27 = vpop.f32.mrf.mxu0  ;;  %v2441_v1 = vpop.f32.mrf.mxu1  ;;  %v1595_v31 = vmax.f32 %v1579_v33, 1e-20  ;;  %v1300_v51 = vmul.f32 %v3648_v34, %v1204_v32 }
 0x296   : > { %v1537_v61 = vadd.f32 %v2440_v63, %v1296_v26  ;;  %v1264_v7 = vpop.permute.xlu0 %1263  ;;  %v2683_v36 = vpop.eup %2682  ;;  %v1205_v63 = vld [vmem:[#allocation4 + $0x78] sm:$0xff] }
 0x297   : > { %v3654_v62 = vpop.f32.mrf.mxu0  ;;  %v2442_v22 = vpop.f32.mrf.mxu1  ;;  %v1297_v5 = vmul.f32 %v1264_v7, %v1201_v3  ;;  %2700 = vrcp.f32 %v1595_v31  ;;  %v1301_v45 = vmul.f32 %v3635_v60, %v1205_v63  ;;  %v1197_v60 = vld [vmem:[#allocation4 + $0x38] sm:$0xff] }
 0x298   : > { %v2685_v59 = vpop.eup %2684  ;;  %1554 = vst.msk [vmem:[#allocation4 + $0x50] sm:$0xff] %vm498_vm9, %v1537_v61  ;;  %v2443_v4 = vadd.f32 %v2442_v22, %v2441_v1 }
 0x299   : > { %1695 = vperm.xlu1 %2589, %v2683_v36   ;;  %1660 = vperm.xlu0 %2588, %v2685_v59   ;;  %v3657_v44 = vpop.f32.mrf.mxu0  ;;  %v2444_v19 = vpop.f32.mrf.mxu1 }
 0x29a   : > { %v1538_v14 = vadd.f32 %v2443_v4, %v1297_v5  ;;  %v1254_v21 = vpop.permute.xlu0 %1253  ;;  %v2687_v18 = vpop.eup %2686  ;;  %v1195_v5 = vld [vmem:[#allocation4 + $0x28] sm:$0xff]  ;;  %v1196_v4 = vld [vmem:[#allocation4 + $0x30] sm:$0xff] }
 0x29b   : > { %v1295_v43 = vmul.f32 %v1254_v21, %v1199_v57  ;;  %v3659_v13 = vpop.f32.mrf.mxu0  ;;  %v2445_v10 = vpop.f32.mrf.mxu1 }
 0x29c   : > { %v2689_v8 = vpop.eup %2688  ;;  %1555 = vst.msk [vmem:[#allocation4 + $0x58] sm:$0xff] %vm498_vm9, %v1538_v14  ;;  %v2446_v42 = vadd.f32 %v2445_v10, %v2444_v19 }
 0x29d   : > { %v1536_v20 = vadd.f32 %v2437_v38, %v1295_v43  ;;  %1690 = vperm.xlu1 %2589, %v2687_v18   ;;  %1650 = vperm.xlu0 %2588, %v2689_v8   ;;  %v3662_v50 = vpop.f32.mrf.mxu0  ;;  %v2447_v54 = vpop.f32.mrf.mxu1  ;;  %v1194_v43 = vld [vmem:[#allocation4 + $0x20] sm:$0xff] }
 0x29e   : > { %v1539_v39 = vadd.f32 %v2446_v42, %v1298_v30  ;;  %v1249_v48 = vpop.permute.xlu0 %1248  ;;  %v2691_v52 = vpop.eup %2690 }
 0x29f   : > { %1553 = vst.msk [vmem:[#allocation4 + $0x48] sm:$0xff] %vm498_vm9, %v1536_v20  ;;  %v1294_v15 = vmul.f32 %v1249_v48, %v1198_v53  ;;  %v3667_v11 = vpop.f32.mrf.mxu0  ;;  %v2448_v58 = vpop.f32.mrf.mxu1 }
 0x2a0   : > { %1556 = vst.msk [vmem:[#allocation4 + $0x60] sm:$0xff] %vm498_vm9, %v1539_v39  ;;  %v2449_v9 = vadd.f32 %v2448_v58, %v2447_v54  ;;  %v2693_v28 = vpop.eup %2692  ;;  %v1193_v39 = vld [vmem:[#allocation4 + $0x18] sm:$0xff]  ;;  %v2419_v41 = vadd.f32 %v3667_v11, %v3662_v50  ;;  %v2413_v50 = vadd.f32 %v3654_v62, %v3652_v27  ;;  %v3696_v27 = vld [vmem:[%s3947_s4] ss:$0 sm:$0xff] }
 0x2a1   : > { %v1535_v49 = vadd.f32 %v2434_v2, %v1294_v15  ;;  %1685 = vperm.xlu1 %2589, %v2691_v52   ;;  %v2695_v7 = vpop.eup %2694 }
 0x2a2   : > { %v1540_v56 = vadd.f32 %v2449_v9, %v1299_v47  ;;  %v2420_v35 = vpop.f32.mrf.mxu0  ;;  %v2450_v0 = vpop.f32.mrf.mxu1  ;;  %v1192_v47 = vld [vmem:[#allocation4 + $0x10] sm:$0xff] }
 0x2a3   : > { %1552 = vst.msk [vmem:[#allocation4 + $0x40] sm:$0xff] %vm498_vm9, %v1535_v49  ;;  %v1244_v25 = vpop.permute.xlu0 %1243  ;;  %v2697_v23 = vpop.eup %2696  ;;  %v2416_v49 = vadd.f32 %v3659_v13, %v3657_v44 }
 0x2a4   : > { %1557 = vst.msk [vmem:[#allocation4 + $0x68] sm:$0xff] %vm498_vm9, %v1540_v56  ;;  %v2421_v37 = vpop.f32.mrf.mxu0  ;;  %v2451_v6 = vpop.f32.mrf.mxu1  ;;  %v1293_v20 = vmul.f32 %v1244_v25, %v1197_v60  ;;  %v1191_v56 = vld [vmem:[#allocation4 + $0x8] sm:$0xff]  ;;  %v1190_v25 = vld [vmem:[#allocation4] sm:$0xff] }
 0x2a5   : > { %v2452_v26 = vadd.f32 %v2451_v6, %v2450_v0  ;;  %1680 = vperm.xlu1 %2589, %v2693_v28   ;;  %v2699_v42 = vpop.eup %2698  ;;  %v2422_v53 = vadd.f32 %v2421_v37, %v2420_v35  ;;  %v2410_v37 = vadd.f32 %v3650_v40, %v3646_v16 }
 0x2a6   : > { %v2423_v12 = vpop.f32.mrf.mxu0  ;;  %v2453_v1 = vpop.f32.mrf.mxu1 }
 0x2a7   : > { %v1541_v3 = vadd.f32 %v2452_v26, %v1300_v51  ;;  %v1239_v61 = vpop.permute.xlu0 %1238  ;;  %v2701_v58 = vpop.eup %2700  ;;  %v3701_v26 = vld [vmem:[%s3949_s6] ss:$0 sm:$0xff] }
 0x2a8   : > { %v2424_v36 = vpop.f32.mrf.mxu0  ;;  %v2454_v22 = vpop.f32.mrf.mxu1  ;;  %v1292_v18 = vmul.f32 %v1239_v61, %v1196_v4  ;;  %v1639_v4 = vld [vmem:[#allocation4 + $0x60] sm:$0xff] }
 0x2a9   : > { %1558 = vst.msk [vmem:[#allocation4 + $0x70] sm:$0xff] %vm498_vm9, %v1541_v3  ;;  %v2455_v59 = vadd.f32 %v2454_v22, %v2453_v1  ;;  %1675 = vperm.xlu1 %2589, %v2695_v7   ;;  %v2425_v19 = vadd.f32 %v2424_v36, %v2423_v12 }
 0x2aa   : > { %v2426_v34 = vpop.f32.mrf.mxu0 }
 0x2ab   : > { %v1542_v57 = vadd.f32 %v2455_v59, %v1301_v45  ;;  %v1234_v46 = vpop.permute.xlu0 %1233  ;;  %v1640_v7 = vld [vmem:[#allocation4 + $0x68] sm:$0xff] }
 0x2ac   : > { %v1291_v14 = vmul.f32 %v1234_v46, %v1195_v5  ;;  %v2427_v21 = vpop.f32.mrf.mxu0 }
 0x2ad   : > { %1559 = vst.msk [vmem:[#allocation4 + $0x78] sm:$0xff] %vm498_vm9, %v1542_v57  ;;  %v2428_v38 = vadd.f32 %v2427_v21, %v2426_v34  ;;  %1665 = vperm.xlu1 %2589, %v2697_v23  }
 0x2ae   : > { %v1532_v10 = vadd.f32 %v2425_v19, %v1291_v14  ;;  %v2429_v29 = vpop.f32.mrf.mxu0  ;;  %v1638_v14 = vld [vmem:[#allocation4 + $0x58] sm:$0xff] }
 0x2af   : > { %v1533_v8 = vadd.f32 %v2428_v38, %v1292_v18  ;;  %v1229_v30 = vpop.permute.xlu0 %1228 }
 0x2b0   : > { %1549 = vst.msk [vmem:[#allocation4 + $0x28] sm:$0xff] %vm498_vm9, %v1532_v10  ;;  %v1290_v24 = vmul.f32 %v1229_v30, %v1194_v43  ;;  %v2430_v17 = vpop.f32.mrf.mxu0  ;;  %v1641_v40 = vld [vmem:[#allocation4 + $0x70] sm:$0xff] }
 0x2b1   : > { %1550 = vst.msk [vmem:[#allocation4 + $0x30] sm:$0xff] %vm498_vm9, %v1533_v8  ;;  %v2431_v54 = vadd.f32 %v2430_v17, %v2429_v29  ;;  %1655 = vperm.xlu1 %2589, %v2699_v42   ;;  %v1637_v10 = vld [vmem:[#allocation4 + $0x50] sm:$0xff]  ;;  %v1636_v17 = vld [vmem:[#allocation4 + $0x48] sm:$0xff] }
 0x2b2   : > { %v1531_v48 = vadd.f32 %v2422_v53, %v1290_v24 }
 0x2b3   : > { %v1534_v2 = vadd.f32 %v2431_v54, %v1293_v20  ;;  %v1224_v15 = vpop.permute.xlu0 %1223 }
 0x2b4   : > { %1548 = vst.msk [vmem:[#allocation4 + $0x20] sm:$0xff] %vm498_vm9, %v1531_v48  ;;  %v1289_v52 = vmul.f32 %v1224_v15, %v1193_v39  ;;  %v1642_v6 = vld [vmem:[#allocation4 + $0x78] sm:$0xff]  ;;  %v1635_v15 = vld [vmem:[#allocation4 + $0x40] sm:$0xff] }
 0x2b5   : > { %1551 = vst.msk [vmem:[#allocation4 + $0x38] sm:$0xff] %vm498_vm9, %v1534_v2  ;;  %1645 = vperm.xlu1 %2589, %v2701_v58  }
 0x2b6   : > { %v1530_v9 = vadd.f32 %v2419_v41, %v1289_v52 }
 0x2b7   : > { %v1219_v33 = vpop.permute.xlu0 %1218  ;;  %v1632_v41 = vld [vmem:[#allocation4 + $0x28] sm:$0xff] }
 0x2b8   : > { %1547 = vst.msk [vmem:[#allocation4 + $0x18] sm:$0xff] %vm498_vm9, %v1530_v9  ;;  %v1288_v32 = vmul.f32 %v1219_v33, %v1192_v47 }
 0x2ba   : > { %v1529_v35 = vadd.f32 %v2416_v49, %v1288_v32 }
 0x2bb   : > { %v1214_v0 = vpop.permute.xlu0 %1213 }
 0x2bc   : > { %1546 = vst.msk [vmem:[#allocation4 + $0x10] sm:$0xff] %vm498_vm9, %v1529_v35  ;;  %v1287_v11 = vmul.f32 %v1214_v0, %v1191_v56  ;;  %v1634_v56 = vld [vmem:[#allocation4 + $0x38] sm:$0xff] }
 0x2be   : > { %v1528_v31 = vadd.f32 %v2413_v50, %v1287_v11 }
 0x2bf   : > { %v1209_v28 = vpop.permute.xlu0 %1208 }
 0x2c0   : > { %1545 = vst.msk [vmem:[#allocation4 + $0x8] sm:$0xff] %vm498_vm9, %v1528_v31  ;;  %v1286_v44 = vmul.f32 %v1209_v28, %v1190_v25  ;;  %v1630_v25 = vld [vmem:[#allocation4 + $0x18] sm:$0xff] }
 0x2c2   : > { %v1527_v13 = vadd.f32 %v2410_v37, %v1286_v44 }
 0x2c4   : > { %1544 = vst.msk [vmem:[#allocation4] sm:$0xff] %vm498_vm9, %v1527_v13  ;;  %v1633_v13 = vld [vmem:[#allocation4 + $0x30] sm:$0xff] }
 0x300   : > { %v1721_v62 = vpop.permute.xlu1 %1720 }
 0x301   : > { %v1738_v51 = vmul.f32 %v1721_v62, %v1642_v6 }
 0x303   : > { %v3704_v16 = vadd.f32 %v3696_v27, %v1738_v51 }
 0x304   : > { %v1716_v63 = vpop.permute.xlu1 %1715 }
 0x305   : > { %v1737_v12 = vmul.f32 %v1716_v63, %v1641_v40  ;;  %v1784_v1 = vmul.f32 %v3701_v26, %v3704_v16  ;;  %v1628_v40 = vld [vmem:[#allocation4 + $0x8] sm:$0xff] }
 0x307   : > { %v3709_v3 = vadd.f32 %v3696_v27, %v1737_v12  ;;  %v1830_v61 = vsel %vm498_vm9, %v1784_v1, 0.0 }
 0x308   : > { %1831 = vadd.xlane.f32.xlu0 %v1830_v61  ;;  %v1711_v36 = vpop.permute.xlu1 %1710 }
 0x309   : > { %v1736_v22 = vmul.f32 %v1711_v36, %v1640_v7  ;;  %v1783_v45 = vmul.f32 %v3701_v26, %v3709_v3  ;;  %v1631_v36 = vld [vmem:[#allocation4 + $0x20] sm:$0xff] }
 0x30b   : > { %v3715_v59 = vadd.f32 %v3696_v27, %v1736_v22  ;;  %v1827_v5 = vsel %vm498_vm9, %v1783_v45, 0.0 }
 0x30c   : > { %1828 = vadd.xlane.f32.xlu1 %v1827_v5  ;;  %v1706_v34 = vpop.permute.xlu1 %1705 }
 0x30d   : > { %v1735_v57 = vmul.f32 %v1706_v34, %v1639_v4  ;;  %v1782_v46 = vmul.f32 %v3701_v26, %v3715_v59 }
 0x30f   : > { %v3721_v23 = vadd.f32 %v3696_v27, %v1735_v57  ;;  %v1824_v19 = vsel %vm498_vm9, %v1782_v46, 0.0 }
 0x310   : > { %1825 = vadd.xlane.f32.xlu0 %v1824_v19  ;;  %v1701_v21 = vpop.permute.xlu1 %1700  ;;  %v1671_v24 = vpop.permute.xlu0 %1670 }
 0x311   : > { %v1734_v18 = vmul.f32 %v1701_v21, %v1638_v14  ;;  %v1781_v38 = vmul.f32 %v3701_v26, %v3721_v23  ;;  %v1728_v9 = vmul.f32 %v1671_v24, %v1632_v41  ;;  %v1629_v14 = vld [vmem:[#allocation4 + $0x10] sm:$0xff] }
 0x313   : > { %v3727_v43 = vadd.f32 %v3696_v27, %v1734_v18  ;;  %v1821_v60 = vsel %vm498_vm9, %v1781_v38, 0.0  ;;  %v3751_v11 = vadd.f32 %v3696_v27, %v1728_v9 }
 0x314   : > { %1822 = vadd.xlane.f32.xlu0 %v1821_v60  ;;  %v1696_v29 = vpop.permute.xlu1 %1695  ;;  %v1661_v33 = vpop.permute.xlu0 %1660 }
 0x315   : > { %v1733_v8 = vmul.f32 %v1696_v29, %v1637_v10  ;;  %v1780_v30 = vmul.f32 %v3701_v26, %v3727_v43  ;;  %v1726_v31 = vmul.f32 %v1661_v33, %v1630_v25  ;;  %v1774_v63 = vmul.f32 %v3701_v26, %v3751_v11 }
 0x317   : > { %v3733_v42 = vadd.f32 %v3696_v27, %v1733_v8  ;;  %v1818_v53 = vsel %vm498_vm9, %v1780_v30, 0.0  ;;  %v3762_v12 = vadd.f32 %v3696_v27, %v1726_v31  ;;  %v1800_v4 = vsel %vm498_vm9, %v1774_v63, 0.0  ;;  %v1627_v30 = vld [vmem:[#allocation4] sm:$0xff] }
 0x318   : > { %1819 = vadd.xlane.f32.xlu1 %v1818_v53  ;;  %v1691_v20 = vpop.permute.xlu1 %1690  ;;  %v1651_v44 = vpop.permute.xlu0 %1650 }
 0x319   : > { %v1732_v54 = vmul.f32 %v1691_v20, %v1636_v17  ;;  %v1779_v39 = vmul.f32 %v3701_v26, %v3733_v42  ;;  %v1724_v1 = vmul.f32 %v1651_v44, %v1628_v40  ;;  %v1772_v19 = vmul.f32 %v3701_v26, %v3762_v12 }
 0x31b   : > { %v3739_v48 = vadd.f32 %v3696_v27, %v1732_v54  ;;  %v1815_v2 = vsel %vm498_vm9, %v1779_v39, 0.0  ;;  %v3772_v34 = vadd.f32 %v3696_v27, %v1724_v1  ;;  %v1794_v10 = vsel %vm498_vm9, %v1772_v19, 0.0 }
 0x31c   : > { %1816 = vadd.xlane.f32.xlu0 %v1815_v2  ;;  %v1686_v58 = vpop.permute.xlu1 %1685 }
 0x31d   : > { %v1731_v52 = vmul.f32 %v1686_v58, %v1635_v15  ;;  %v1778_v47 = vmul.f32 %v3701_v26, %v3739_v48  ;;  %v1770_v8 = vmul.f32 %v3701_v26, %v3772_v34  ;;  %v3799_v58 = vld [vmem:[#allocation5] ss:$0 sm:$0xff] }
 0x31f   : > { %v3745_v49 = vadd.f32 %v3696_v27, %v1731_v52  ;;  %v1812_v32 = vsel %vm498_vm9, %v1778_v47, 0.0  ;;  %v1788_v54 = vsel %vm498_vm9, %v1770_v8, 0.0 }
 0x320   : > { %1813 = vadd.xlane.f32.xlu1 %v1812_v32  ;;  %v1681_v35 = vpop.permute.xlu1 %1680 }
 0x321   : > { %v1730_v0 = vmul.f32 %v1681_v35, %v1634_v56  ;;  %v1777_v50 = vmul.f32 %v3701_v26, %v3745_v49 }
 0x323   : > { %v3754_v28 = vadd.f32 %v3696_v27, %v1730_v0  ;;  %v1809_v37 = vsel %vm498_vm9, %v1777_v50, 0.0 }
 0x324   : > { %1810 = vadd.xlane.f32.xlu0 %v1809_v37  ;;  %v1676_v6 = vpop.permute.xlu1 %1675 }
 0x325   : > { %v1729_v62 = vmul.f32 %v1676_v6, %v1633_v13  ;;  %v1776_v51 = vmul.f32 %v3701_v26, %v3754_v28 }
 0x327   : > { %v3765_v61 = vadd.f32 %v3696_v27, %v1729_v62  ;;  %v1806_v7 = vsel %vm498_vm9, %v1776_v51, 0.0 }
 0x328   : > { %1807 = vadd.xlane.f32.xlu1 %v1806_v7  ;;  %v1666_v22 = vpop.permute.xlu1 %1665 }
 0x329   : > { %v1727_v45 = vmul.f32 %v1666_v22, %v1631_v36  ;;  %v1775_v5 = vmul.f32 %v3701_v26, %v3765_v61 }
 0x32b   : > { %v3775_v57 = vadd.f32 %v3696_v27, %v1727_v45  ;;  %v1803_v46 = vsel %vm498_vm9, %v1775_v5, 0.0 }
 0x32c   : > { %1801 = vadd.xlane.f32.xlu1 %v1800_v4  ;;  %1804 = vadd.xlane.f32.xlu0 %v1803_v46  ;;  %v1656_v21 = vpop.permute.xlu1 %1655 }
 0x32d   : > { %v1725_v18 = vmul.f32 %v1656_v21, %v1629_v14  ;;  %v1773_v38 = vmul.f32 %v3701_v26, %v3775_v57 }
 0x32f   : > { %v3783_v60 = vadd.f32 %v3696_v27, %v1725_v18  ;;  %v1797_v29 = vsel %vm498_vm9, %v1773_v38, 0.0 }
 0x330   : > { %1795 = vadd.xlane.f32.xlu1 %v1794_v10  ;;  %1798 = vadd.xlane.f32.xlu0 %v1797_v29  ;;  %v1646_v53 = vpop.permute.xlu1 %1645 }
 0x331   : > { %v1723_v24 = vmul.f32 %v1646_v53, %v1627_v30  ;;  %v1771_v17 = vmul.f32 %v3701_v26, %v3783_v60 }
 0x333   : > { %v3792_v20 = vadd.f32 %v3696_v27, %v1723_v24  ;;  %v1791_v39 = vsel %vm498_vm9, %v1771_v17, 0.0 }
 0x334   : > { %1789 = vadd.xlane.f32.xlu1 %v1788_v54  ;;  %1792 = vadd.xlane.f32.xlu0 %v1791_v39 }
 0x335   : > { %v1769_v2 = vmul.f32 %v3701_v26, %v3792_v20 }
 0x337   : > { %v1785_v15 = vsel %vm498_vm9, %v1769_v2, 0.0 }
 0x338   : > { %1786 = vadd.xlane.f32.xlu0 %v1785_v15 }
 0x391   : > { %v1832_v41 = vpop.xlane.xlu0 %1831 }
 0x392   : > { %v1855_v52 = vadd.f32 %v3799_v58, %v1832_v41 }
 0x394   : > { %v2385_v47 = vmul.f32 -1.442695, %v1855_v52 }
 0x395   : > { %v1829_v27 = vpop.xlane.xlu1 %1828 }
 0x396   : > { %2702 = vpow2.f32 %v2385_v47  ;;  %v1854_v9 = vadd.f32 %v3799_v58, %v1829_v27 }
 0x398   : > { %v2384_v33 = vmul.f32 -1.442695, %v1854_v9 }
 0x399   : > { %v1826_v32 = vpop.xlane.xlu0 %1825 }
 0x39a   : > { %2704 = vpow2.f32 %v2384_v33  ;;  %v1853_v56 = vadd.f32 %v3799_v58, %v1826_v32 }
 0x39c   : > { %v2383_v35 = vmul.f32 -1.442695, %v1853_v56 }
 0x39d   : > { %v1823_v26 = vpop.xlane.xlu0 %1822 }
 0x39e   : > { %2706 = vpow2.f32 %v2383_v35  ;;  %v1852_v0 = vadd.f32 %v3799_v58, %v1823_v26 }
 0x3a0   : > { %v2382_v50 = vmul.f32 -1.442695, %v1852_v0 }
 0x3a1   : > { %v1820_v25 = vpop.xlane.xlu1 %1819 }
 0x3a2   : > { %2708 = vpow2.f32 %v2382_v50  ;;  %v1851_v31 = vadd.f32 %v3799_v58, %v1820_v25 }
 0x3a3   : > { %v2703_v37 = vpop.eup %2702 }
 0x3a4   : > { %v1919_v44 = vadd.f32 1.0, %v2703_v37  ;;  %v2381_v13 = vmul.f32 -1.442695, %v1851_v31 }
 0x3a5   : > { %v1817_v6 = vpop.xlane.xlu0 %1816 }
 0x3a6   : > { %2710 = vrcp.f32 %v1919_v44  ;;  %v1850_v62 = vadd.f32 %v3799_v58, %v1817_v6 }
 0x3a7   : > { %v2705_v51 = vpop.eup %2704  ;;  %2712 = vpow2.f32 %v2381_v13 }
 0x3a8   : > { %v1918_v40 = vadd.f32 1.0, %v2705_v51  ;;  %v2380_v63 = vmul.f32 -1.442695, %v1850_v62 }
 0x3a9   : > { %v1814_v1 = vpop.xlane.xlu1 %1813 }
 0x3aa   : > { %2714 = vrcp.f32 %v1918_v40  ;;  %v1849_v7 = vadd.f32 %v3799_v58, %v1814_v1 }
 0x3ab   : > { %v2707_v36 = vpop.eup %2706  ;;  %2716 = vpow2.f32 %v2380_v63 }
 0x3ac   : > { %v1917_v22 = vadd.f32 1.0, %v2707_v36  ;;  %v2379_v45 = vmul.f32 -1.442695, %v1849_v7 }
 0x3ad   : > { %v1811_v5 = vpop.xlane.xlu0 %1810 }
 0x3ae   : > { %2718 = vrcp.f32 %v1917_v22  ;;  %v1848_v4 = vadd.f32 %v3799_v58, %v1811_v5 }
 0x3af   : > { %v2709_v46 = vpop.eup %2708  ;;  %2720 = vpow2.f32 %v2379_v45 }
 0x3b0   : > { %v1916_v19 = vadd.f32 1.0, %v2709_v46  ;;  %v2378_v14 = vmul.f32 -1.442695, %v1848_v4 }
 0x3b1   : > { %v1808_v21 = vpop.xlane.xlu1 %1807 }
 0x3b2   : > { %2722 = vrcp.f32 %v1916_v19  ;;  %v1847_v18 = vadd.f32 %v3799_v58, %v1808_v21 }
 0x3b3   : > { %v3810_v38 = vpop.eup %2710  ;;  %2724 = vpow2.f32 %v2378_v14 }
 0x3b4   : > { %v2713_v10 = vpop.eup %2712  ;;  %v2377_v29 = vmul.f32 -1.442695, %v1847_v18  ;;  %2029 = vperm.xlu1 %2589, %v3810_v38  }
 0x3b5   : > { %v1915_v8 = vadd.f32 1.0, %v2713_v10  ;;  %v1805_v30 = vpop.xlane.xlu0 %1804  ;;  %v1802_v53 = vpop.xlane.xlu1 %1801 }
 0x3b6   : > { %2726 = vpow2.f32 %v2377_v29  ;;  %v1846_v24 = vadd.f32 %v3799_v58, %v1805_v30  ;;  %v1845_v17 = vadd.f32 %v3799_v58, %v1802_v53 }
 0x3b7   : > { %v3815_v54 = vpop.eup %2714  ;;  %2728 = vrcp.f32 %v1915_v8 }
 0x3b8   : > { %v2717_v39 = vpop.eup %2716  ;;  %v2376_v2 = vmul.f32 -1.442695, %v1846_v24  ;;  %v2375_v15 = vmul.f32 -1.442695, %v1845_v17  ;;  %2024 = vperm.xlu0 %2588, %v3815_v54  }
 0x3b9   : > { %v1914_v41 = vadd.f32 1.0, %v2717_v39  ;;  %v1799_v52 = vpop.xlane.xlu0 %1798  ;;  %v1796_v47 = vpop.xlane.xlu1 %1795 }
 0x3ba   : > { %2730 = vpow2.f32 %v2376_v2  ;;  %v1844_v27 = vadd.f32 %v3799_v58, %v1799_v52  ;;  %v1843_v9 = vadd.f32 %v3799_v58, %v1796_v47 }
 0x3bb   : > { %v3820_v33 = vpop.eup %2718  ;;  %2732 = vrcp.f32 %v1914_v41 }
 0x3bc   : > { %v2721_v32 = vpop.eup %2720  ;;  %2734 = vpow2.f32 %v2375_v15  ;;  %v2374_v56 = vmul.f32 -1.442695, %v1844_v27  ;;  %v2373_v35 = vmul.f32 -1.442695, %v1843_v9  ;;  %2019 = vperm.xlu1 %2589, %v3820_v33  }
 0x3bd   : > { %v1913_v26 = vadd.f32 1.0, %v2721_v32  ;;  %v1793_v0 = vpop.xlane.xlu0 %1792  ;;  %v1790_v50 = vpop.xlane.xlu1 %1789 }
 0x3be   : > { %2736 = vpow2.f32 %v2374_v56  ;;  %v1842_v25 = vadd.f32 %v3799_v58, %v1793_v0  ;;  %v1841_v31 = vadd.f32 %v3799_v58, %v1790_v50 }
 0x3bf   : > { %v3825_v37 = vpop.eup %2722  ;;  %2738 = vrcp.f32 %v1913_v26 }
 0x3c0   : > { %v2725_v44 = vpop.eup %2724  ;;  %2740 = vpow2.f32 %v2373_v35  ;;  %v2372_v13 = vmul.f32 -1.442695, %v1842_v25  ;;  %v2371_v6 = vmul.f32 -1.442695, %v1841_v31  ;;  %2014 = vperm.xlu1 %2589, %v3825_v37  }
 0x3c1   : > { %v1912_v62 = vadd.f32 1.0, %v2725_v44  ;;  %v1787_v51 = vpop.xlane.xlu0 %1786 }
 0x3c2   : > { %2742 = vpow2.f32 %v2372_v13  ;;  %v1840_v40 = vadd.f32 %v3799_v58, %v1787_v51 }
 0x3c3   : > { %v2727_v63 = vpop.eup %2726  ;;  %2744 = vrcp.f32 %v1912_v62 }
 0x3c4   : > { %v2729_v1 = vpop.eup %2728  ;;  %v1911_v7 = vadd.f32 1.0, %v2727_v63  ;;  %2746 = vpow2.f32 %v2371_v6  ;;  %v2370_v36 = vmul.f32 -1.442695, %v1840_v40 }
 0x3c5   : > { %2009 = vperm.xlu0 %2588, %v2729_v1  }
 0x3c6   : > { %2748 = vrcp.f32 %v1911_v7 }
 0x3c7   : > { %v2731_v22 = vpop.eup %2730  ;;  %2750 = vpow2.f32 %v2370_v36 }
 0x3c8   : > { %v2733_v45 = vpop.eup %2732  ;;  %v1910_v5 = vadd.f32 1.0, %v2731_v22 }
 0x3c9   : > { %v2735_v4 = vpop.eup %2734  ;;  %2004 = vperm.xlu1 %2589, %v2733_v45  }
 0x3ca   : > { %2752 = vrcp.f32 %v1910_v5  ;;  %v1909_v46 = vadd.f32 1.0, %v2735_v4 }
 0x3cb   : > { %v2737_v19 = vpop.eup %2736 }
 0x3cc   : > { %v2739_v14 = vpop.eup %2738  ;;  %2754 = vrcp.f32 %v1909_v46  ;;  %v1908_v58 = vadd.f32 1.0, %v2737_v19 }
 0x3cd   : > { %v2741_v21 = vpop.eup %2740  ;;  %1999 = vperm.xlu0 %2588, %v2739_v14  }
 0x3ce   : > { %2756 = vrcp.f32 %v1908_v58  ;;  %v1907_v18 = vadd.f32 1.0, %v2741_v21 }
 0x3cf   : > { %v2743_v10 = vpop.eup %2742 }
 0x3d0   : > { %v2745_v29 = vpop.eup %2744  ;;  %2758 = vrcp.f32 %v1907_v18  ;;  %v1906_v8 = vadd.f32 1.0, %v2743_v10 }
 0x3d1   : > { %v2747_v30 = vpop.eup %2746  ;;  %1994 = vperm.xlu1 %2589, %v2745_v29  }
 0x3d2   : > { %2760 = vrcp.f32 %v1906_v8  ;;  %v1905_v53 = vadd.f32 1.0, %v2747_v30 }
 0x3d3   : > { %v2749_v24 = vpop.eup %2748 }
 0x3d4   : > { %v2751_v17 = vpop.eup %2750  ;;  %2762 = vrcp.f32 %v1905_v53  ;;  %1989 = vperm.xlu0 %2588, %v2749_v24  }
 0x3d5   : > { %v1904_v39 = vadd.f32 1.0, %v2751_v17 }
 0x3d7   : > { %v2753_v2 = vpop.eup %2752  ;;  %2764 = vrcp.f32 %v1904_v39 }
 0x3d8   : > { %1984 = vperm.xlu1 %2589, %v2753_v2  }
 0x3d9   : > { %v2755_v15 = vpop.eup %2754 }
 0x3da   : > { %1979 = vperm.xlu0 %2588, %v2755_v15  }
 0x3db   : > { %v2757_v41 = vpop.eup %2756 }
 0x3dc   : > { %1974 = vperm.xlu1 %2589, %v2757_v41  }
 0x3dd   : > { %v2759_v52 = vpop.eup %2758 }
 0x3de   : > { %1969 = vperm.xlu0 %2588, %v2759_v52  }
 0x3df   : > { %v2761_v47 = vpop.eup %2760 }
 0x3e0   : > { %1964 = vperm.xlu1 %2589, %v2761_v47  }
 0x3e1   : > { %v2763_v27 = vpop.eup %2762 }
 0x3e2   : > { %1959 = vperm.xlu0 %2588, %v2763_v27  }
 0x3e4   : > { %v2765_v9 = vpop.eup %2764 }
 0x3e5   : > { %1954 = vperm.xlu1 %2589, %v2765_v9  }
 0x400   : > { %2121 = vxpose.xlu0.b32.start [1/16] (narrow) %v2765_v9, 8 }
 0x404   : > { %2122 = vxpose.xlu0.b32.cont [2/16] (narrow) %v2763_v27, 8 }
 0x408   : > { %2123 = vxpose.xlu0.b32.cont [3/16] (narrow) %v2761_v47, 8 }
 0x40c   : > { %2124 = vxpose.xlu0.b32.cont [4/16] (narrow) %v2759_v52, 8 }
 0x410   : > { %2125 = vxpose.xlu0.b32.cont [5/16] (narrow) %v2757_v41, 8 }
 0x414   : > { %2126 = vxpose.xlu0.b32.cont [6/16] (narrow) %v2755_v15, 8 }
 0x418   : > { %2127 = vxpose.xlu0.b32.cont [7/16] (narrow) %v2753_v2, 8 }
 0x41c   : > { %2128 = vxpose.xlu0.b32.cont [8/16] (narrow) %v2749_v24, 8 }
 0x420   : > { %2129 = vxpose.xlu0.b32.cont [9/16] (narrow) %v2745_v29, 8 }
 0x424   : > { %2130 = vxpose.xlu0.b32.cont [10/16] (narrow) %v2739_v14, 8 }
 0x428   : > { %2131 = vxpose.xlu0.b32.cont [11/16] (narrow) %v2733_v45, 8 }
 0x42c   : > { %2132 = vxpose.xlu0.b32.cont [12/16] (narrow) %v2729_v1, 8 }
 0x42f   : > { %v2030_v32 = vpop.permute.xlu1 %2029 }
 0x430   : > { %2133 = vxpose.xlu0.b32.cont [13/16] (narrow) %v3825_v37, 8  ;;  %v2047_v56 = vmul.f32 %v2030_v32, %v3704_v16 }
 0x432   : > { %2474 = vmatpush3.msra.mxu1 %v2047_v56 }
 0x433   : > { %v2025_v35 = vpop.permute.xlu0 %2024  ;;  %2475 = vmatprep.subr.mxu1 %v3968_v55 }
 0x434   : > { %2134 = vxpose.xlu0.b32.cont [14/16] (narrow) %v3820_v33, 8  ;;  %v2046_v26 = vmul.f32 %v2025_v35, %v3709_v3 }
 0x436   : > { %2476 = vmatpush3.msra.mxu1 %v2046_v26 }
 0x437   : > { %v2020_v0 = vpop.permute.xlu1 %2019  ;;  %2477 = vmatprep.subr.mxu1 %v3968_v55 }
 0x438   : > { %2135 = vxpose.xlu0.b32.cont [15/16] (narrow) %v3815_v54, 8  ;;  %v2045_v50 = vmul.f32 %v2020_v0, %v3715_v59 }
 0x43a   : > { %2478 = vmatpush3.msra.mxu1 %v2045_v50 }
 0x43b   : > { %v2015_v25 = vpop.permute.xlu1 %2014  ;;  %2479 = vmatprep.subr.mxu1 %v3968_v55 }
 0x43c   : > { %2136 = vxpose.xlu0.b32.end [16/16] (narrow) %v3810_v38, 8  ;;  %v2044_v16 = vmul.f32 %v2015_v25, %v3721_v23 }
 0x43e   : > { %2480 = vmatpush3.msra.mxu1 %v2044_v16 }
 0x43f   : > { %2481 = vmatprep.subr.mxu1 %v3968_v55 }
 0x440   : > { %v2010_v3 = vpop.permute.xlu0 %2009 }
 0x441   : > { %v2043_v33 = vmul.f32 %v2010_v3, %v3727_v43 }
 0x443   : > { %2482 = vmatpush3.msra.mxu1 %v2043_v33 }
 0x444   : > { %v2005_v31 = vpop.permute.xlu1 %2004  ;;  %2483 = vmatprep.subr.mxu1 %v3968_v55 }
 0x445   : > { %v2042_v59 = vmul.f32 %v2005_v31, %v3733_v42 }
 0x447   : > { %2484 = vmatpush3.msra.mxu1 %v2042_v59 }
 0x448   : > { %v2000_v54 = vpop.permute.xlu0 %1999  ;;  %2485 = vmatprep.subr.mxu1 %v3968_v55 }
 0x449   : > { %v2041_v38 = vmul.f32 %v2000_v54, %v3739_v48 }
 0x44b   : > { %2486 = vmatpush3.msra.mxu1 %v2041_v38 }
 0x44c   : > { %v1995_v23 = vpop.permute.xlu1 %1994  ;;  %2487 = vmatprep.subr.mxu1 %v3968_v55 }
 0x44d   : > { %v2040_v43 = vmul.f32 %v1995_v23, %v3745_v49 }
 0x44f   : > { %2488 = vmatpush3.msra.mxu1 %v2040_v43  ;;  %v1990_v37 = vpop.permute.xlu0 %1989 }
 0x450   : > { %v2039_v44 = vmul.f32 %v1990_v37, %v3754_v28  ;;  %2489 = vmatprep.subr.mxu1 %v3968_v55 }
 0x452   : > { %2490 = vmatpush3.msra.mxu1 %v2039_v44 }
 0x453   : > { %v1985_v42 = vpop.permute.xlu1 %1984  ;;  %2491 = vmatprep.subr.mxu1 %v3968_v55 }
 0x454   : > { %v2038_v48 = vmul.f32 %v1985_v42, %v3765_v61 }
 0x455   : > { %v1980_v13 = vpop.permute.xlu0 %1979 }
 0x456   : > { %v2037_v6 = vmul.f32 %v1980_v13, %v3751_v11  ;;  %2492 = vmatpush3.msra.mxu1 %v2038_v48 }
 0x457   : > { %2493 = vmatprep.subr.mxu1 %v3968_v55  ;;  %v1975_v49 = vpop.permute.xlu1 %1974 }
 0x458   : > { %v2036_v62 = vmul.f32 %v1975_v49, %v3775_v57  ;;  %2494 = vmatpush3.msra.mxu1 %v2037_v6 }
 0x459   : > { %v1970_v28 = vpop.permute.xlu0 %1969  ;;  %2495 = vmatprep.subr.mxu1 %v3968_v55 }
 0x45a   : > { %v2035_v51 = vmul.f32 %v1970_v28, %v3762_v12  ;;  %2496 = vmatpush3.msra.mxu1 %v2036_v62 }
 0x45b   : > { %2497 = vmatprep.subr.mxu1 %v3968_v55  ;;  %v1965_v61 = vpop.permute.xlu1 %1964 }
 0x45c   : > { %v2034_v11 = vmul.f32 %v1965_v61, %v3783_v60  ;;  %2498 = vmatpush3.msra.mxu1 %v2035_v51  ;;  %v2048_v60 = vld [vmem:[%s455_s17] sm:$0x3]  ;;  %s2772_s17 = scalar_lea.vmem %s2771_s7, 32 }
 0x45d   : > { %v1960_v40 = vpop.permute.xlu0 %1959  ;;  %2499 = vmatprep.subr.mxu1 %v3968_v55  ;;  %p2774_p5 = scmp.lt.s32.totalorder %s2772_s17, %s2766_s30 }
 0x45e   : > { %v2033_v57 = vmul.f32 %v1960_v40, %v3772_v34  ;;  %2500 = vmatpush3.msra.mxu1 %v2034_v11 }
 0x45f   : > { %2501 = vmatprep.subr.mxu1 %v3968_v55  ;;  %p2775_p6 = por %p2774_p5, %p2773_p3 }
 0x460   : > { %v1955_v12 = vpop.permute.xlu1 %1954  ;;  %2502 = vmatpush3.msra.mxu1 %v2033_v57 }
 0x461   : > { %v2032_v63 = vmul.f32 %v1955_v12, %v3792_v20  ;;  %2503 = vmatprep.subr.mxu1 %v3968_v55  ;;  %p2776_p7 = pnand %p2775_p6, %p2769_p2 }
 0x463   : > { %2504 = vmatpush3.msra.mxu1 %v2032_v63 }
 0x464   : > { %2506 = vmatmul.mubr.f32.vlgmr.msra.gmra.mxu1 %v2048_v60 }
 0x47c   : > { %v2137_v34 = vpop.trf.xlu0 }
 0x47d   : > { %2153 = vst [vmem:[%s422_s21] sm:$0x1] %v2137_v34 }
 0x47e   : > { %2779 = shalt.err (!%p2776_p7)
}
 0x47f   : > { %s2780_s21 = scalar_lea.hbm %s2183_s28, 16  ;;  %s2784_s27 = scalar_lea.hbm %s3952_s9, 32 }
 0x480   : > { %p2781_p9 = scmp.ne.s32.totalorder %s2183_s28, %s2780_s21  ;;  %p2785_p12 = scmp.lt.s32.totalorder %s2183_s28, %s3952_s9 }
 0x481   : > { %p2786_p13 = scmp.lt.s32.totalorder %s2784_s27, %s2780_s21 }
 0x482   : > { %p2782_p10 = pnand %p2781_p9, %p2973_p4 }
 0x483   : > { %p2787_p0 = por %p2786_p13, %p2785_p12 }
 0x484   : > { %p2783_p11 = pneg %p2782_p10 }
 0x486   : > { %p2788_p1 = pnand %p2787_p0, %p2783_p11 }
 0x488   : > { %2791 = shalt.err (!%p2788_p1)
}
 0x489   : > { %2525 = dma.vmem_to_hbm [thread:$0]  (%p2973_p4), %s2186_s25, 16, %s2183_s28, %s2160_s29   ;;  %vm2119_vm2 = vcmask 254976  }
 0x48a   : > { %s2344_s30 = sshll.u32 %s3871_s19, 1  ;;  %s2387_s10 = sshll.u32 %s2864_s14, 5 }
 0x48b   : > { %s416_s7 = scalar_lea.vmem [#allocation6], %s2344_s30  ;;  %s3896_s0 = scalar_lea.hbm %s3951_s8, %s2387_s10 }
 0x48c   : > { %s2172_s17 = sshll.u32 %s416_s7, 4  ;;  %s2155_s1 = scalar_lea.sflag [#allocation7], %s3871_s19  ;;  %s3898_s17 = int_to_ptr.vmem [resolvable:$true] %s2172_s17 }
 0x48d   : > { %s2792_s25 = scalar_lea.vmem %s3898_s17, 32  ;;  %s2879_s14 = smov [#allocation6]  }
 0x48e   : > { %p2793_p2 = scmp.ne.s32.totalorder %s3898_s17, %s2792_s25  ;;  %s2796_s28 = sshll.u32 %s2879_s14, 4  ;;  %s2797_s28 = int_to_ptr.vmem [resolvable:$false] %s2796_s28 }
 0x48f   : > { %s2798_s29 = scalar_lea.vmem %s2797_s28, 64  ;;  %p2799_p6 = scmp.lt.s32.totalorder %s3898_s17, %s2797_s28 }
 0x490   : > { %p2794_p3 = pnand %p2793_p2, %p2973_p4  ;;  %p2800_p7 = scmp.lt.s32.totalorder %s2798_s29, %s2792_s25 }
 0x492   : > { %p2795_p5 = pneg %p2794_p3  ;;  %p2801_p9 = por %p2800_p7, %p2799_p6 }
 0x494   : > { %p2802_p10 = pnand %p2801_p9, %p2795_p5 }
 0x524   : > { %v2115_v55 = vpop.f32.mrf.mxu1 }
 0x525   : > { %2120 = vst.msk [vmem:[%s416_s7] sm:$0x3] %vm2119_vm2, %v2115_v55 }
 0x526   : > { %v2507_v20 = vpop.f32.mrf.mxu1 }
 0x527   : > { %2805 = shalt.err (!%p2802_p10)
}
 0x528   : > { %s2806_s21 = scalar_lea.hbm %s3896_s0, 32  ;;  %s2810_s30 = scalar_lea.hbm %s3951_s8, 64 }
 0x529   : > { %p2807_p11 = scmp.ne.s32.totalorder %s3896_s0, %s2806_s21  ;;  %p2811_p0 = scmp.lt.s32.totalorder %s3896_s0, %s3951_s8 }
 0x52a   : > { %p2812_p1 = scmp.lt.s32.totalorder %s2810_s30, %s2806_s21 }
 0x52b   : > { %p2808_p12 = pnand %p2807_p11, %p2973_p4 }
 0x52c   : > { %p2813_p2 = por %p2812_p1, %p2811_p0 }
 0x52d   : > { %p2809_p13 = pneg %p2808_p12 }
 0x52f   : > { %p2814_p3 = pnand %p2813_p2, %p2809_p13 }
 0x531   : > { %2817 = shalt.err (!%p2814_p3)
}
 0x532   : > { %2524 = dma.vmem_to_hbm [thread:$0]  (%p2973_p4), %s3898_s17, 32, %s3896_s0, %s2155_s1  }
 0x533 PF: > { %p2535_p5 = scmp.ge.s32.totalorder %s2872_s16, 2  ;;  %s2197_s24 = sand.u32 1, %s2852_s11  }
 0x534   : > { %s2198_s26 = scalar_lea.sflag [#allocation7], %s2197_s24 }
 0x535   : > { %p2529_p6 = pnand %p2535_p5, %p2980_p8 }
 0x537   : > { %p2530_p7 = pneg %p2529_p6 }
 0x539   : > { %2843 = dma.done.wait (%p2530_p7), %s2198_s26, 32  }
 0x53a   : > { %2845 = vsyncadd (%p2530_p7), %s2198_s26, 4294967264  ;;  %s2207_s25 = scalar_lea.sflag [#allocation9], %s2197_s24 }
 0x53b   : > { %2847 = dma.done.wait (%p2530_p7), %s2207_s25, 16  }
 0x53c   : > { %2849 = vsyncadd (%p2530_p7), %s2207_s25, 4294967280  ;;  %s28_s16 = sadd.s32 1, %s2872_s16   ;;  %s3981_s11 = smov %s2856_s12 }
 0x53d   : > { %p25_p9 = scmp.ge.s32.totalorder %s28_s16, 4   ;;  %s3982_s12 = smov %s2860_s13 }
 0x53e   : > { %s3983_s13 = smov %s2986_s23  ;;  %s3984_s14 = smov %s2868_s15 }
 0x53f   : > { %s3985_s15 = smov %s3987_s18  ;;  %27 = sbr.rel (!%p25_p9) target bundleno = 9 (0x9), region = 124 }
 0x544   :  { %2211 = vsyncpa [#allocation7], 1 }
 0x545   :  { %2213 = vsyncpa [#allocation7 + $0x1], 1 }
 0x546   :  { %2214 = vsyncpa [#allocation9], 1 }
 0x547   :  { %2216 = vsyncpa [#allocation9 + $0x1], 1 }

</bundles_post_ra>
